<compile_context>
chip_gen: v5e
topology: v5e:2x2
jax: 0.10.0
libtpu: 0.0.40
codegen_flags: <defaults>
</compile_context>

<pallas_src>
import functools

import jax
import jax.numpy as jnp
from jax.experimental import pallas as pl
from jax.experimental.pallas import tpu as pltpu

EPS = 1e-5
NEG_INF = -1e9   # finite "-inf" so reduced-precision softmax never sees NaN/Inf


def _layernorm(x, g, b):
    mu = jnp.mean(x, axis=-1, keepdims=True)
    var = jnp.mean(jnp.square(x - mu), axis=-1, keepdims=True)
    return (x - mu) * jax.lax.rsqrt(var + EPS) * g + b


def _vmem_limit_bytes():
    # Per-generation VMEM budget: ~3/4 of physical (96 MiB on v5e/v6e 128 MiB,
    # 48 MiB on v7x 64 MiB).  Safe fallback if the query is unavailable.
    try:
        cap = int(pltpu.get_tpu_info().vmem_capacity_bytes)
        return min((cap * 3) // 4, 100 * 1024 * 1024)
    except Exception:
        return 48 * 1024 * 1024


# -----------------------------------------------------------------------------
# One kernel: residual-attention-block stack + TCP injection + ln_final + proj.
# -----------------------------------------------------------------------------
def _stack_kernel(eot_ref,                       # scalar prefetch: (N,) int32 in SMEM
                  x0_ref, cf_ref, wmix_ref, mask_ref,
                  ln1_g, ln1_b, w_qkv, b_qkv, w_out, b_out,
                  ln2_g, ln2_b, w_fc1, b_fc1, w_fc2, b_fc2,
                  lnf_g, lnf_b, proj_ref,
                  out_ref, resid_sc,
                  *, num_heads, inject_layer, n_ctx, mlp_chunk):
    b = pl.program_id(0)
    l = pl.program_id(1)
    B, L, D = resid_sc.shape
    H = num_heads
    Dh = D // H

    # ---- layer 0 of this batch block: residual stream <- prompts + pos_emb ----
    @pl.when(l == 0)
    def _init():
        resid_sc[...] = x0_ref[...]

    # ---- TCP class-aware context injection before layer `inject_layer` ----
    # TODO(synk): exact TCP injection formula unavailable; scalar weight-mix of
    # class_feature into the n_ctx context-token rows (rows 1 .. n_ctx).
    @pl.when(l == inject_layer)
    def _inject():
        w = wmix_ref[0]
        cur = resid_sc[:, 1:1 + n_ctx, :]
        resid_sc[:, 1:1 + n_ctx, :] = w * cf_ref[...] + (1.0 - w) * cur

    x = resid_sc[...]                                     # (B, L, D) f32 residual

    # ---- multi-head self-attention (causal); 1/sqrt(Dh) pre-folded into W_q ----
    xn = _layernorm(x, ln1_g[0, 0], ln1_b[0, 0])
    qkv = (jnp.dot(xn.reshape(B * L, D).astype(jnp.bfloat16), w_qkv[0],
                   preferred_element_type=jnp.float32)
           + b_qkv[0, 0]).astype(jnp.bfloat16).reshape(B, L, 3 * D)
    q, k, v = qkv[:, :, :D], qkv[:, :, D:2 * D], qkv[:, :, 2 * D:]
    mask = mask_ref[...][None]                            # (1, L, L) f32

    heads = []
    for h in range(H):                                    # static; see TODO above
        sl = slice(h * Dh, (h + 1) * Dh)
        s = jax.lax.dot_general(q[:, :, sl], k[:, :, sl],
                                (((2,), (2,)), ((0,), (0,))),
                                preferred_element_type=jnp.float32)   # (B,L,L)
        p = jax.nn.softmax(s + mask, axis=-1)                          # f32
        oh = jax.lax.dot_general(p.astype(jnp.bfloat16), v[:, :, sl],
                                 (((2,), (1,)), ((0,), (0,))),
                                 preferred_element_type=jnp.float32)  # (B,L,Dh)
        heads.append(oh.astype(jnp.bfloat16))
    attn = jnp.concatenate(heads, axis=-1).reshape(B * L, D)   # one lane-dense value
    attn = jnp.dot(attn, w_out[0], preferred_element_type=jnp.float32) + b_out[0, 0]
    resid_sc[...] = x + attn.reshape(B, L, D)

    # ---- MLP (QuickGELU), chunked over batch rows to bound f32 (rows,Dm) temps ----
    g2, be2 = ln2_g[0, 0], ln2_b[0, 0]
    wf1, bf1 = w_fc1[0], b_fc1[0, 0]
    wf2, bf2 = w_fc2[0], b_fc2[0, 0]
    cb = mlp_chunk

    def _mlp_body(c, carry):
        r0 = pl.multiple_of(c * cb, cb)
        xc = resid_sc[pl.ds(r0, cb)]                      # (cb, L, D) f32
        h1 = jnp.dot(_layernorm(xc, g2, be2).reshape(cb * L, D).astype(jnp.bfloat16),
                     wf1, preferred_element_type=jnp.float32) + bf1
        h1 = (h1 * jax.nn.sigmoid(1.702 * h1)).astype(jnp.bfloat16)   # QuickGELU
        h2 = jnp.dot(h1, wf2, preferred_element_type=jnp.float32) + bf2
        resid_sc[pl.ds(r0, cb)] = xc + h2.reshape(cb, L, D)
        return carry

    jax.lax.fori_loop(0, B // cb, _mlp_body, 0)

    # ---- last layer: gather EOT rows, ln_final, text projection ----
    @pl.when(l == pl.num_programs(1) - 1)
    def _head():
        rows = [resid_sc[i, pl.ds(eot_ref[b * B + i], 1), :] for i in range(B)]
        xe = _layernorm(jnp.concatenate(rows, axis=0), lnf_g[0], lnf_b[0])   # (B, D)
        out_ref[0] = jnp.dot(xe.astype(jnp.bfloat16), proj_ref[...],
                             preferred_element_type=jnp.float32)


# -----------------------------------------------------------------------------
# TextEncoder.forward (flag=False path)
# -----------------------------------------------------------------------------
def text_encoder_forward(prompts, class_feature, weight, tokenized_prompts, params,
                         *, batch_block=None, mlp_batch_chunk=None):
    N, L, D = prompts.shape
    n_layers = params["w_qkv"].shape[0]
    H = params["num_heads"]
    inject_layer = params["inject_layer"]
    n_ctx = class_feature.shape[1]
    P = params["proj"].shape[1]
    assert D % H == 0, "d_model must be divisible by num_heads"
    assert 1 + n_ctx <= L

    # On v7x (2 TensorCores) pick batch_block so nb >= 2; on v5e/v6e a larger
    # batch_block (fewer blocks) amortizes weight re-streaming better.
    B = N if batch_block is None else batch_block
    assert N % B == 0, "batch_block must divide the batch"
    nb = N // B

    cb = B if mlp_batch_chunk is None else min(mlp_batch_chunk, B)
    assert B % cb == 0

    # x0 = prompts + positional embedding (read once per batch block, layer 0).
    x0 = prompts.astype(jnp.float32) + params["pos_emb"][None].astype(jnp.float32)

    # Fold the 1/sqrt(Dh) attention scale into the Q columns of W_qkv / b_qkv.
    scale = 1.0 / float(D // H) ** 0.5
    w_qkv = params["w_qkv"].at[:, :, :D].multiply(scale)
    b_qkv = params["b_qkv"].at[:, :, :D].multiply(scale)

    # Causal mask, hoisted out of the kernel (finite -inf).
    row = jax.lax.broadcasted_iota(jnp.int32, (L, L), 0)
    col = jax.lax.broadcasted_iota(jnp.int32, (L, L), 1)
    mask = jnp.where(col > row, NEG_INF, 0.0).astype(jnp.float32)

    # EOT positions (CLIP convention: EOT token has the largest id) + mix weight.
    eot = jnp.argmax(tokenized_prompts, axis=-1).astype(jnp.int32)        # (N,)
    wmix = jnp.reshape(jnp.asarray(weight, jnp.float32), (1,))
    cf = class_feature.astype(jnp.float32)

    def per_layer(arr):
        nd = arr.ndim
        return pl.BlockSpec((1,) + arr.shape[1:],
                            lambda b, l, *_: (l,) + (0,) * (nd - 1))

    def shared(arr):
        nd = arr.ndim
        return pl.BlockSpec(arr.shape, lambda b, l, *_: (0,) * nd)

    in_specs = [
        pl.BlockSpec((B, L, D), lambda b, l, *_: (b, 0, 0)),        # x0
        pl.BlockSpec((B, n_ctx, D), lambda b, l, *_: (b, 0, 0)),    # class_feature
        pl.BlockSpec(memory_space=pltpu.MemorySpace.SMEM),          # mix weight
        shared(mask),                                               # causal mask
    ] + [per_layer(a) for a in (
        params["ln1_g"], params["ln1_b"], w_qkv, b_qkv,
        params["w_out"], params["b_out"], params["ln2_g"], params["ln2_b"],
        params["w_fc1"], params["b_fc1"], params["w_fc2"], params["b_fc2"])
    ] + [shared(params["lnf_g"]), shared(params["lnf_b"]), shared(params["proj"])]

    kernel = functools.partial(_stack_kernel, num_heads=H,
                               inject_layer=inject_layer, n_ctx=n_ctx,
                               mlp_chunk=cb)

    out = pl.pallas_call(
        kernel,
        out_shape=jax.ShapeDtypeStruct((nb, B, P), jnp.float32),
        grid_spec=pltpu.PrefetchScalarGridSpec(
            num_scalar_prefetch=1,
            grid=(nb, n_layers),
            in_specs=in_specs,
            out_specs=pl.BlockSpec((1, B, P), lambda b, l, *_: (b, 0, 0)),
            scratch_shapes=[pltpu.VMEM((B, L, D), jnp.float32)]),
        compiler_params=pltpu.CompilerParams(
            dimension_semantics=("parallel", "arbitrary"),
            vmem_limit_bytes=_vmem_limit_bytes()),
    )(eot, x0, cf, wmix, mask,
      params["ln1_g"], params["ln1_b"], w_qkv, b_qkv,
      params["w_out"], params["b_out"], params["ln2_g"], params["ln2_b"],
      params["w_fc1"], params["b_fc1"], params["w_fc2"], params["b_fc2"],
      params["lnf_g"], params["lnf_b"], params["proj"])

    return out.reshape(N, P)


# -----------------------------------------------------------------------------
# Deterministic synthetic parameters (shapes implied by the CLIP text encoder).
# Per-layer weights stacked on a leading layer axis; matmul weights in bf16.
# -----------------------------------------------------------------------------
def make_params(key, *, n_layers, seq, d_model, n_heads, d_mlp, proj_dim, inject_layer):
    counter = [0]

    def nrm(shape, scale=0.02, dtype=jnp.float32):
        counter[0] += 1
        k = jax.random.fold_in(key, counter[0])
        return (scale * jax.random.normal(k, shape, jnp.float32)).astype(dtype)

    D, Dm = d_model, d_mlp
    return dict(
        pos_emb=nrm((seq, D)),
        num_heads=n_heads,
        inject_layer=inject_layer,
        ln1_g=jnp.ones((n_layers, 1, D), jnp.float32),
        ln1_b=jnp.zeros((n_layers, 1, D), jnp.float32),
        w_qkv=nrm((n_layers, D, 3 * D), dtype=jnp.bfloat16),   # in_proj_weight.T
        b_qkv=nrm((n_layers, 1, 3 * D)),
        w_out=nrm((n_layers, D, D), dtype=jnp.bfloat16),       # out_proj.weight.T
        b_out=nrm((n_layers, 1, D)),
        ln2_g=jnp.ones((n_layers, 1, D), jnp.float32),
        ln2_b=jnp.zeros((n_layers, 1, D), jnp.float32),
        w_fc1=nrm((n_layers, D, Dm), dtype=jnp.bfloat16),      # c_fc.weight.T
        b_fc1=nrm((n_layers, 1, Dm)),
        w_fc2=nrm((n_layers, Dm, D), dtype=jnp.bfloat16),      # c_proj.weight.T
        b_fc2=nrm((n_layers, 1, D)),
        lnf_g=jnp.ones((1, D), jnp.float32),
        lnf_b=jnp.zeros((1, D), jnp.float32),
        proj=nrm((D, proj_dim), dtype=jnp.bfloat16),
    )


if __name__ == "__main__":
    # Small demo shapes.  NOTE: tuning (batch_block, mlp chunk, vmem limit)
    # should be re-done at real CLIP sizes (L=77, D=512, H=8, Dm=2048, 12 layers).
    N, L, D = 4, 8, 32          # n_cls (batch), seq, transformer width
    H, DM, P = 4, 128, 32       # heads, mlp width, text_projection out dim
    N_LAYERS, N_CTX, INJ = 2, 4, 1

    key = jax.random.PRNGKey(0)
    kp, kc, kprm = jax.random.split(key, 3)

    params = make_params(kprm, n_layers=N_LAYERS, seq=L, d_model=D, n_heads=H,
                         d_mlp=DM, proj_dim=P, inject_layer=INJ)

    prompts = 0.1 * jax.random.normal(kp, (N, L, D), jnp.float32)
    class_feature = 0.1 * jax.random.normal(kc, (N, N_CTX, D), jnp.float32)
    weight = jnp.float32(0.3)
    # tokenized_prompts: argmax(-1) picks the EOT position (5, 7, 3, 6 here)
    tokenized_prompts = jnp.array(
        [[1, 2, 3, 4, 5, 100, 0, 0],
         [1, 2, 3, 4, 5, 6, 7, 200],
         [1, 2, 3, 150, 0, 0, 0, 0],
         [1, 2, 3, 4, 5, 6, 180, 0]], dtype=jnp.int32)

    out = text_encoder_forward(prompts, class_feature, weight, tokenized_prompts,
                               params, batch_block=2, mlp_batch_chunk=1)
    jax.block_until_ready(out)
    assert out.shape == (N, P) and out.dtype == jnp.float32
    print("KERNEL_OK")
</pallas_src>

<mosaic_0001>
module attributes {stable_mosaic.version = 11 : i64} {
  func.func @_stack_kernel(%arg0: i32, %arg1: i32, %arg2: memref<4xi32, #tpu.memory_space<smem>>, %arg3: memref<2x8x32xf32, #tpu.memory_space<vmem>>, %arg4: memref<2x4x32xf32, #tpu.memory_space<vmem>>, %arg5: memref<1xf32, #tpu.memory_space<smem>>, %arg6: memref<8x8xf32, #tpu.memory_space<vmem>>, %arg7: memref<1x1x32xf32, #tpu.memory_space<vmem>>, %arg8: memref<1x1x32xf32, #tpu.memory_space<vmem>>, %arg9: memref<1x32x96xbf16, #tpu.memory_space<vmem>>, %arg10: memref<1x1x96xf32, #tpu.memory_space<vmem>>, %arg11: memref<1x32x32xbf16, #tpu.memory_space<vmem>>, %arg12: memref<1x1x32xf32, #tpu.memory_space<vmem>>, %arg13: memref<1x1x32xf32, #tpu.memory_space<vmem>>, %arg14: memref<1x1x32xf32, #tpu.memory_space<vmem>>, %arg15: memref<1x32x128xbf16, #tpu.memory_space<vmem>>, %arg16: memref<1x1x128xf32, #tpu.memory_space<vmem>>, %arg17: memref<1x128x32xbf16, #tpu.memory_space<vmem>>, %arg18: memref<1x1x32xf32, #tpu.memory_space<vmem>>, %arg19: memref<1x32xf32, #tpu.memory_space<vmem>>, %arg20: memref<1x32xf32, #tpu.memory_space<vmem>>, %arg21: memref<32x32xbf16, #tpu.memory_space<vmem>>, %arg22: memref<1x2x32xf32, #tpu.memory_space<vmem>>, %arg23: memref<2x8x32xf32, #tpu.memory_space<vmem>>) attributes {dimension_semantics = [#tpu.dimension_semantics<parallel>, #tpu.dimension_semantics<arbitrary>], iteration_bounds = array<i64: 2, 2>, scalar_prefetch = 1 : i64, scratch_operands = 1 : i64, tpu.core_type = #tpu.core_type<tc>, window_params = [{transform_indices = @transform_0, window_bounds = array<i64: 2, 8, 32>}, {transform_indices = @transform_1, window_bounds = array<i64: 2, 4, 32>}, {transform_indices = @transform_2, window_bounds = array<i64: 1>}, {pipeline_mode = #tpu.pipeline_mode<synchronous>, transform_indices = @transform_3, window_bounds = array<i64: 8, 8>}, {transform_indices = @transform_4, window_bounds = array<i64: 1, 1, 32>}, {transform_indices = @transform_5, window_bounds = array<i64: 1, 1, 32>}, {transform_indices = @transform_6, window_bounds = array<i64: 1, 32, 96>}, {transform_indices = @transform_7, window_bounds = array<i64: 1, 1, 96>}, {transform_indices = @transform_8, window_bounds = array<i64: 1, 32, 32>}, {transform_indices = @transform_9, window_bounds = array<i64: 1, 1, 32>}, {transform_indices = @transform_10, window_bounds = array<i64: 1, 1, 32>}, {transform_indices = @transform_11, window_bounds = array<i64: 1, 1, 32>}, {transform_indices = @transform_12, window_bounds = array<i64: 1, 32, 128>}, {transform_indices = @transform_13, window_bounds = array<i64: 1, 1, 128>}, {transform_indices = @transform_14, window_bounds = array<i64: 1, 128, 32>}, {transform_indices = @transform_15, window_bounds = array<i64: 1, 1, 32>}, {pipeline_mode = #tpu.pipeline_mode<synchronous>, transform_indices = @transform_16, window_bounds = array<i64: 1, 32>}, {pipeline_mode = #tpu.pipeline_mode<synchronous>, transform_indices = @transform_17, window_bounds = array<i64: 1, 32>}, {pipeline_mode = #tpu.pipeline_mode<synchronous>, transform_indices = @transform_18, window_bounds = array<i64: 32, 32>}, {transform_indices = @transform_19, window_bounds = array<i64: 1, 2, 32>}]} {
    %c0_i32 = arith.constant 0 : i32
    %0 = arith.cmpi eq, %arg1, %c0_i32 : i32
    %1 = arith.extui %0 : i1 to i32
    %c0_i32_0 = arith.constant 0 : i32
    %2 = arith.cmpi ne, %1, %c0_i32_0 : i32
    scf.if %2 {
      %c0_76 = arith.constant 0 : index
      %c0_77 = arith.constant 0 : index
      %c0_78 = arith.constant 0 : index
      %161 = vector.load %arg3[%c0_76, %c0_77, %c0_78] : memref<2x8x32xf32, #tpu.memory_space<vmem>>, vector<2x8x32xf32>
      %c0_79 = arith.constant 0 : index
      %c0_80 = arith.constant 0 : index
      %c0_81 = arith.constant 0 : index
      %162 = vector.load %arg23[%c0_79, %c0_80, %c0_81] : memref<2x8x32xf32, #tpu.memory_space<vmem>>, vector<2x8x32xf32>
      tpu.vector_store %arg23[%c0_79, %c0_80, %c0_81], %161 {strides = array<i32>} : memref<2x8x32xf32, #tpu.memory_space<vmem>>, vector<2x8x32xf32>,
    } else {
    }
    %c1_i32 = arith.constant 1 : i32
    %3 = arith.cmpi eq, %arg1, %c1_i32 : i32
    %4 = arith.extui %3 : i1 to i32
    %c0_i32_1 = arith.constant 0 : i32
    %5 = arith.cmpi ne, %4, %c0_i32_1 : i32
    scf.if %5 {
      %c0_76 = arith.constant 0 : index
      %161 = memref.load %arg5[%c0_76] : memref<1xf32, #tpu.memory_space<smem>>
      %c0_77 = arith.constant 0 : index
      %c1 = arith.constant 1 : index
      %c0_78 = arith.constant 0 : index
      %162 = vector.load %arg23[%c0_77, %c1, %c0_78] : memref<2x8x32xf32, #tpu.memory_space<vmem>>, vector<2x4x32xf32>
      %c0_79 = arith.constant 0 : index
      %c0_80 = arith.constant 0 : index
      %c0_81 = arith.constant 0 : index
      %163 = vector.load %arg4[%c0_79, %c0_80, %c0_81] : memref<2x4x32xf32, #tpu.memory_space<vmem>>, vector<2x4x32xf32>
      %164 = vector.broadcast %161 : f32 to vector<2x4x32xf32>
      %165 = arith.mulf %164, %163 : vector<2x4x32xf32>
      %cst_82 = arith.constant 1.000000e+00 : f32
      %166 = arith.subf %cst_82, %161 : f32
      %167 = vector.broadcast %166 : f32 to vector<2x4x32xf32>
      %168 = arith.mulf %167, %162 : vector<2x4x32xf32>
      %169 = arith.addf %165, %168 : vector<2x4x32xf32>
      %c0_83 = arith.constant 0 : index
      %c1_84 = arith.constant 1 : index
      %c0_85 = arith.constant 0 : index
      %170 = vector.load %arg23[%c0_83, %c1_84, %c0_85] : memref<2x8x32xf32, #tpu.memory_space<vmem>>, vector<2x4x32xf32>
      tpu.vector_store %arg23[%c0_83, %c1_84, %c0_85], %169 {strides = array<i32>} : memref<2x8x32xf32, #tpu.memory_space<vmem>>, vector<2x4x32xf32>,
    } else {
    }
    %c0 = arith.constant 0 : index
    %c0_2 = arith.constant 0 : index
    %c0_3 = arith.constant 0 : index
    %6 = vector.load %arg23[%c0, %c0_2, %c0_3] : memref<2x8x32xf32, #tpu.memory_space<vmem>>, vector<2x8x32xf32>
    %c0_4 = arith.constant 0 : index
    %c0_5 = arith.constant 0 : index
    %c0_6 = arith.constant 0 : index
    %7 = vector.load %arg7[%c0_4, %c0_5, %c0_6] : memref<1x1x32xf32, #tpu.memory_space<vmem>>, vector<1x1x32xf32>
    %8 = vector.shape_cast %7 : vector<1x1x32xf32> to vector<32xf32>
    %c0_7 = arith.constant 0 : index
    %c0_8 = arith.constant 0 : index
    %c0_9 = arith.constant 0 : index
    %9 = vector.load %arg8[%c0_7, %c0_8, %c0_9] : memref<1x1x32xf32, #tpu.memory_space<vmem>>, vector<1x1x32xf32>
    %10 = vector.shape_cast %9 : vector<1x1x32xf32> to vector<32xf32>
    %cst = arith.constant dense<0.000000e+00> : vector<2x8xf32>
    %11 = vector.multi_reduction <add>, %6, %cst [2] : vector<2x8x32xf32> to vector<2x8xf32>
    %12 = vector.shape_cast %11 : vector<2x8xf32> to vector<2x8x1xf32>
    %cst_10 = arith.constant 3.200000e+01 : f32
    %13 = vector.broadcast %cst_10 : f32 to vector<2x8x1xf32>
    %14 = arith.divf %12, %13 : vector<2x8x1xf32>
    %15 = vector.broadcast %14 : vector<2x8x1xf32> to vector<2x8x32xf32>
    %16 = arith.subf %6, %15 : vector<2x8x32xf32>
    %17 = arith.mulf %16, %16 : vector<2x8x32xf32>
    %cst_11 = arith.constant dense<0.000000e+00> : vector<2x8xf32>
    %18 = vector.multi_reduction <add>, %17, %cst_11 [2] : vector<2x8x32xf32> to vector<2x8xf32>
    %19 = vector.shape_cast %18 : vector<2x8xf32> to vector<2x8x1xf32>
    %cst_12 = arith.constant 3.200000e+01 : f32
    %20 = vector.broadcast %cst_12 : f32 to vector<2x8x1xf32>
    %21 = arith.divf %19, %20 : vector<2x8x1xf32>
    %22 = vector.broadcast %14 : vector<2x8x1xf32> to vector<2x8x32xf32>
    %23 = arith.subf %6, %22 : vector<2x8x32xf32>
    %cst_13 = arith.constant 9.99999974E-6 : f32
    %24 = vector.broadcast %cst_13 : f32 to vector<2x8x1xf32>
    %25 = arith.addf %21, %24 : vector<2x8x1xf32>
    %26 = math.rsqrt %25 : vector<2x8x1xf32>
    %27 = vector.broadcast %26 : vector<2x8x1xf32> to vector<2x8x32xf32>
    %28 = arith.mulf %23, %27 : vector<2x8x32xf32>
    %29 = vector.shape_cast %8 : vector<32xf32> to vector<1x1x32xf32>
    %30 = vector.broadcast %29 : vector<1x1x32xf32> to vector<2x8x32xf32>
    %31 = arith.mulf %28, %30 : vector<2x8x32xf32>
    %32 = vector.shape_cast %10 : vector<32xf32> to vector<1x1x32xf32>
    %33 = vector.broadcast %32 : vector<1x1x32xf32> to vector<2x8x32xf32>
    %34 = arith.addf %31, %33 : vector<2x8x32xf32>
    %35 = vector.shape_cast %34 : vector<2x8x32xf32> to vector<16x32xf32>
    %36 = arith.truncf %35 : vector<16x32xf32> to vector<16x32xbf16>
    %c0_14 = arith.constant 0 : index
    %c0_15 = arith.constant 0 : index
    %c0_16 = arith.constant 0 : index
    %37 = vector.load %arg9[%c0_14, %c0_15, %c0_16] : memref<1x32x96xbf16, #tpu.memory_space<vmem>>, vector<1x32x96xbf16>
    %38 = vector.shape_cast %37 : vector<1x32x96xbf16> to vector<32x96xbf16>
    %cst_17 = arith.constant dense<0.000000e+00> : vector<16x96xf32>
    %39 = tpu.matmul %36, %38, %cst_17 {dimension_numbers = #tpu.dot_dimension_numbers<[1], [0], [0], [1], [0, 0, 1, 1], [], []>} : vector<16x32xbf16>, vector<32x96xbf16>, vector<16x96xf32> -> vector<16x96xf32>
    %c0_18 = arith.constant 0 : index
    %c0_19 = arith.constant 0 : index
    %c0_20 = arith.constant 0 : index
    %40 = vector.load %arg10[%c0_18, %c0_19, %c0_20] : memref<1x1x96xf32, #tpu.memory_space<vmem>>, vector<1x1x96xf32>
    %41 = vector.shape_cast %40 : vector<1x1x96xf32> to vector<96xf32>
    %42 = vector.shape_cast %41 : vector<96xf32> to vector<1x96xf32>
    %43 = vector.broadcast %42 : vector<1x96xf32> to vector<16x96xf32>
    %44 = arith.addf %39, %43 : vector<16x96xf32>
    %45 = arith.truncf %44 : vector<16x96xf32> to vector<16x96xbf16>
    %46 = vector.shape_cast %45 : vector<16x96xbf16> to vector<2x8x96xbf16>
    %47 = vector.extract_strided_slice %46 {offsets = [0, 0, 0], sizes = [2, 8, 32], strides = [1, 1, 1]} : vector<2x8x96xbf16> to vector<2x8x32xbf16>
    %48 = vector.extract_strided_slice %46 {offsets = [0, 0, 32], sizes = [2, 8, 32], strides = [1, 1, 1]} : vector<2x8x96xbf16> to vector<2x8x32xbf16>
    %49 = vector.extract_strided_slice %46 {offsets = [0, 0, 64], sizes = [2, 8, 32], strides = [1, 1, 1]} : vector<2x8x96xbf16> to vector<2x8x32xbf16>
    %c0_21 = arith.constant 0 : index
    %c0_22 = arith.constant 0 : index
    %50 = vector.load %arg6[%c0_21, %c0_22] : memref<8x8xf32, #tpu.memory_space<vmem>>, vector<8x8xf32>
    %51 = vector.shape_cast %50 : vector<8x8xf32> to vector<1x8x8xf32>
    %52 = vector.extract_strided_slice %47 {offsets = [0, 0, 0], sizes = [2, 8, 8], strides = [1, 1, 1]} : vector<2x8x32xbf16> to vector<2x8x8xbf16>
    %53 = vector.extract_strided_slice %48 {offsets = [0, 0, 0], sizes = [2, 8, 8], strides = [1, 1, 1]} : vector<2x8x32xbf16> to vector<2x8x8xbf16>
    %cst_23 = arith.constant dense<0.000000e+00> : vector<2x8x8xf32>
    %54 = tpu.matmul %52, %53, %cst_23 {dimension_numbers = #tpu.dot_dimension_numbers<[2], [2], [1], [1], [0, 0, 0, 1, 1, 1], [0], [0]>} : vector<2x8x8xbf16>, vector<2x8x8xbf16>, vector<2x8x8xf32> -> vector<2x8x8xf32>
    %55 = vector.broadcast %51 : vector<1x8x8xf32> to vector<2x8x8xf32>
    %56 = arith.addf %54, %55 : vector<2x8x8xf32>
    %cst_24 = arith.constant dense<0xFF800000> : vector<2x8xf32>
    %57 = vector.multi_reduction <maximumf>, %56, %cst_24 [2] : vector<2x8x8xf32> to vector<2x8xf32>
    %cst_25 = arith.constant 0xFF800000 : f32
    %58 = vector.broadcast %cst_25 : f32 to vector<2x8xf32>
    %59 = arith.maximumf %58, %57 : vector<2x8xf32>
    %60 = vector.shape_cast %59 : vector<2x8xf32> to vector<2x8x1xf32>
    %61 = vector.broadcast %60 : vector<2x8x1xf32> to vector<2x8x8xf32>
    %62 = arith.subf %56, %61 : vector<2x8x8xf32>
    %63 = math.exp %62 : vector<2x8x8xf32>
    %cst_26 = arith.constant dense<0.000000e+00> : vector<2x8xf32>
    %64 = vector.multi_reduction <add>, %63, %cst_26 [2] : vector<2x8x8xf32> to vector<2x8xf32>
    %65 = vector.shape_cast %64 : vector<2x8xf32> to vector<2x8x1xf32>
    %66 = vector.broadcast %65 : vector<2x8x1xf32> to vector<2x8x8xf32>
    %67 = arith.divf %63, %66 : vector<2x8x8xf32>
    %68 = arith.truncf %67 : vector<2x8x8xf32> to vector<2x8x8xbf16>
    %69 = vector.extract_strided_slice %49 {offsets = [0, 0, 0], sizes = [2, 8, 8], strides = [1, 1, 1]} : vector<2x8x32xbf16> to vector<2x8x8xbf16>
    %cst_27 = arith.constant dense<0.000000e+00> : vector<2x8x8xf32>
    %70 = tpu.matmul %68, %69, %cst_27 {dimension_numbers = #tpu.dot_dimension_numbers<[2], [1], [1], [2], [0, 0, 0, 1, 1, 2], [0], [0]>} : vector<2x8x8xbf16>, vector<2x8x8xbf16>, vector<2x8x8xf32> -> vector<2x8x8xf32>
    %71 = arith.truncf %70 : vector<2x8x8xf32> to vector<2x8x8xbf16>
    %72 = vector.extract_strided_slice %47 {offsets = [0, 0, 8], sizes = [2, 8, 8], strides = [1, 1, 1]} : vector<2x8x32xbf16> to vector<2x8x8xbf16>
    %73 = vector.extract_strided_slice %48 {offsets = [0, 0, 8], sizes = [2, 8, 8], strides = [1, 1, 1]} : vector<2x8x32xbf16> to vector<2x8x8xbf16>
    %cst_28 = arith.constant dense<0.000000e+00> : vector<2x8x8xf32>
    %74 = tpu.matmul %72, %73, %cst_28 {dimension_numbers = #tpu.dot_dimension_numbers<[2], [2], [1], [1], [0, 0, 0, 1, 1, 1], [0], [0]>} : vector<2x8x8xbf16>, vector<2x8x8xbf16>, vector<2x8x8xf32> -> vector<2x8x8xf32>
    %75 = vector.broadcast %51 : vector<1x8x8xf32> to vector<2x8x8xf32>
    %76 = arith.addf %74, %75 : vector<2x8x8xf32>
    %cst_29 = arith.constant dense<0xFF800000> : vector<2x8xf32>
    %77 = vector.multi_reduction <maximumf>, %76, %cst_29 [2] : vector<2x8x8xf32> to vector<2x8xf32>
    %cst_30 = arith.constant 0xFF800000 : f32
    %78 = vector.broadcast %cst_30 : f32 to vector<2x8xf32>
    %79 = arith.maximumf %78, %77 : vector<2x8xf32>
    %80 = vector.shape_cast %79 : vector<2x8xf32> to vector<2x8x1xf32>
    %81 = vector.broadcast %80 : vector<2x8x1xf32> to vector<2x8x8xf32>
    %82 = arith.subf %76, %81 : vector<2x8x8xf32>
    %83 = math.exp %82 : vector<2x8x8xf32>
    %cst_31 = arith.constant dense<0.000000e+00> : vector<2x8xf32>
    %84 = vector.multi_reduction <add>, %83, %cst_31 [2] : vector<2x8x8xf32> to vector<2x8xf32>
    %85 = vector.shape_cast %84 : vector<2x8xf32> to vector<2x8x1xf32>
    %86 = vector.broadcast %85 : vector<2x8x1xf32> to vector<2x8x8xf32>
    %87 = arith.divf %83, %86 : vector<2x8x8xf32>
    %88 = arith.truncf %87 : vector<2x8x8xf32> to vector<2x8x8xbf16>
    %89 = vector.extract_strided_slice %49 {offsets = [0, 0, 8], sizes = [2, 8, 8], strides = [1, 1, 1]} : vector<2x8x32xbf16> to vector<2x8x8xbf16>
    %cst_32 = arith.constant dense<0.000000e+00> : vector<2x8x8xf32>
    %90 = tpu.matmul %88, %89, %cst_32 {dimension_numbers = #tpu.dot_dimension_numbers<[2], [1], [1], [2], [0, 0, 0, 1, 1, 2], [0], [0]>} : vector<2x8x8xbf16>, vector<2x8x8xbf16>, vector<2x8x8xf32> -> vector<2x8x8xf32>
    %91 = arith.truncf %90 : vector<2x8x8xf32> to vector<2x8x8xbf16>
    %92 = vector.extract_strided_slice %47 {offsets = [0, 0, 16], sizes = [2, 8, 8], strides = [1, 1, 1]} : vector<2x8x32xbf16> to vector<2x8x8xbf16>
    %93 = vector.extract_strided_slice %48 {offsets = [0, 0, 16], sizes = [2, 8, 8], strides = [1, 1, 1]} : vector<2x8x32xbf16> to vector<2x8x8xbf16>
    %cst_33 = arith.constant dense<0.000000e+00> : vector<2x8x8xf32>
    %94 = tpu.matmul %92, %93, %cst_33 {dimension_numbers = #tpu.dot_dimension_numbers<[2], [2], [1], [1], [0, 0, 0, 1, 1, 1], [0], [0]>} : vector<2x8x8xbf16>, vector<2x8x8xbf16>, vector<2x8x8xf32> -> vector<2x8x8xf32>
    %95 = vector.broadcast %51 : vector<1x8x8xf32> to vector<2x8x8xf32>
    %96 = arith.addf %94, %95 : vector<2x8x8xf32>
    %cst_34 = arith.constant dense<0xFF800000> : vector<2x8xf32>
    %97 = vector.multi_reduction <maximumf>, %96, %cst_34 [2] : vector<2x8x8xf32> to vector<2x8xf32>
    %cst_35 = arith.constant 0xFF800000 : f32
    %98 = vector.broadcast %cst_35 : f32 to vector<2x8xf32>
    %99 = arith.maximumf %98, %97 : vector<2x8xf32>
    %100 = vector.shape_cast %99 : vector<2x8xf32> to vector<2x8x1xf32>
    %101 = vector.broadcast %100 : vector<2x8x1xf32> to vector<2x8x8xf32>
    %102 = arith.subf %96, %101 : vector<2x8x8xf32>
    %103 = math.exp %102 : vector<2x8x8xf32>
    %cst_36 = arith.constant dense<0.000000e+00> : vector<2x8xf32>
    %104 = vector.multi_reduction <add>, %103, %cst_36 [2] : vector<2x8x8xf32> to vector<2x8xf32>
    %105 = vector.shape_cast %104 : vector<2x8xf32> to vector<2x8x1xf32>
    %106 = vector.broadcast %105 : vector<2x8x1xf32> to vector<2x8x8xf32>
    %107 = arith.divf %103, %106 : vector<2x8x8xf32>
    %108 = arith.truncf %107 : vector<2x8x8xf32> to vector<2x8x8xbf16>
    %109 = vector.extract_strided_slice %49 {offsets = [0, 0, 16], sizes = [2, 8, 8], strides = [1, 1, 1]} : vector<2x8x32xbf16> to vector<2x8x8xbf16>
    %cst_37 = arith.constant dense<0.000000e+00> : vector<2x8x8xf32>
    %110 = tpu.matmul %108, %109, %cst_37 {dimension_numbers = #tpu.dot_dimension_numbers<[2], [1], [1], [2], [0, 0, 0, 1, 1, 2], [0], [0]>} : vector<2x8x8xbf16>, vector<2x8x8xbf16>, vector<2x8x8xf32> -> vector<2x8x8xf32>
    %111 = arith.truncf %110 : vector<2x8x8xf32> to vector<2x8x8xbf16>
    %112 = vector.extract_strided_slice %47 {offsets = [0, 0, 24], sizes = [2, 8, 8], strides = [1, 1, 1]} : vector<2x8x32xbf16> to vector<2x8x8xbf16>
    %113 = vector.extract_strided_slice %48 {offsets = [0, 0, 24], sizes = [2, 8, 8], strides = [1, 1, 1]} : vector<2x8x32xbf16> to vector<2x8x8xbf16>
    %cst_38 = arith.constant dense<0.000000e+00> : vector<2x8x8xf32>
    %114 = tpu.matmul %112, %113, %cst_38 {dimension_numbers = #tpu.dot_dimension_numbers<[2], [2], [1], [1], [0, 0, 0, 1, 1, 1], [0], [0]>} : vector<2x8x8xbf16>, vector<2x8x8xbf16>, vector<2x8x8xf32> -> vector<2x8x8xf32>
    %115 = vector.broadcast %51 : vector<1x8x8xf32> to vector<2x8x8xf32>
    %116 = arith.addf %114, %115 : vector<2x8x8xf32>
    %cst_39 = arith.constant dense<0xFF800000> : vector<2x8xf32>
    %117 = vector.multi_reduction <maximumf>, %116, %cst_39 [2] : vector<2x8x8xf32> to vector<2x8xf32>
    %cst_40 = arith.constant 0xFF800000 : f32
    %118 = vector.broadcast %cst_40 : f32 to vector<2x8xf32>
    %119 = arith.maximumf %118, %117 : vector<2x8xf32>
    %120 = vector.shape_cast %119 : vector<2x8xf32> to vector<2x8x1xf32>
    %121 = vector.broadcast %120 : vector<2x8x1xf32> to vector<2x8x8xf32>
    %122 = arith.subf %116, %121 : vector<2x8x8xf32>
    %123 = math.exp %122 : vector<2x8x8xf32>
    %cst_41 = arith.constant dense<0.000000e+00> : vector<2x8xf32>
    %124 = vector.multi_reduction <add>, %123, %cst_41 [2] : vector<2x8x8xf32> to vector<2x8xf32>
    %125 = vector.shape_cast %124 : vector<2x8xf32> to vector<2x8x1xf32>
    %126 = vector.broadcast %125 : vector<2x8x1xf32> to vector<2x8x8xf32>
    %127 = arith.divf %123, %126 : vector<2x8x8xf32>
    %128 = arith.truncf %127 : vector<2x8x8xf32> to vector<2x8x8xbf16>
    %129 = vector.extract_strided_slice %49 {offsets = [0, 0, 24], sizes = [2, 8, 8], strides = [1, 1, 1]} : vector<2x8x32xbf16> to vector<2x8x8xbf16>
    %cst_42 = arith.constant dense<0.000000e+00> : vector<2x8x8xf32>
    %130 = tpu.matmul %128, %129, %cst_42 {dimension_numbers = #tpu.dot_dimension_numbers<[2], [1], [1], [2], [0, 0, 0, 1, 1, 2], [0], [0]>} : vector<2x8x8xbf16>, vector<2x8x8xbf16>, vector<2x8x8xf32> -> vector<2x8x8xf32>
    %131 = arith.truncf %130 : vector<2x8x8xf32> to vector<2x8x8xbf16>
    %132 = tpu.concatenate %71, %91, %111, %131 in 2 : vector<2x8x8xbf16>, vector<2x8x8xbf16>, vector<2x8x8xbf16>, vector<2x8x8xbf16> -> vector<2x8x32xbf16>
    %133 = vector.shape_cast %132 : vector<2x8x32xbf16> to vector<16x32xbf16>
    %c0_43 = arith.constant 0 : index
    %c0_44 = arith.constant 0 : index
    %c0_45 = arith.constant 0 : index
    %134 = vector.load %arg11[%c0_43, %c0_44, %c0_45] : memref<1x32x32xbf16, #tpu.memory_space<vmem>>, vector<1x32x32xbf16>
    %135 = vector.shape_cast %134 : vector<1x32x32xbf16> to vector<32x32xbf16>
    %cst_46 = arith.constant dense<0.000000e+00> : vector<16x32xf32>
    %136 = tpu.matmul %133, %135, %cst_46 {dimension_numbers = #tpu.dot_dimension_numbers<[1], [0], [0], [1], [0, 0, 1, 1], [], []>} : vector<16x32xbf16>, vector<32x32xbf16>, vector<16x32xf32> -> vector<16x32xf32>
    %c0_47 = arith.constant 0 : index
    %c0_48 = arith.constant 0 : index
    %c0_49 = arith.constant 0 : index
    %137 = vector.load %arg12[%c0_47, %c0_48, %c0_49] : memref<1x1x32xf32, #tpu.memory_space<vmem>>, vector<1x1x32xf32>
    %138 = vector.shape_cast %137 : vector<1x1x32xf32> to vector<32xf32>
    %139 = vector.shape_cast %138 : vector<32xf32> to vector<1x32xf32>
    %140 = vector.broadcast %139 : vector<1x32xf32> to vector<16x32xf32>
    %141 = arith.addf %136, %140 : vector<16x32xf32>
    %142 = vector.shape_cast %141 : vector<16x32xf32> to vector<2x8x32xf32>
    %143 = arith.addf %6, %142 : vector<2x8x32xf32>
    %c0_50 = arith.constant 0 : index
    %c0_51 = arith.constant 0 : index
    %c0_52 = arith.constant 0 : index
    %144 = vector.load %arg23[%c0_50, %c0_51, %c0_52] : memref<2x8x32xf32, #tpu.memory_space<vmem>>, vector<2x8x32xf32>
    tpu.vector_store %arg23[%c0_50, %c0_51, %c0_52], %143 {strides = array<i32>} : memref<2x8x32xf32, #tpu.memory_space<vmem>>, vector<2x8x32xf32>,
    %c0_53 = arith.constant 0 : index
    %c0_54 = arith.constant 0 : index
    %c0_55 = arith.constant 0 : index
    %145 = vector.load %arg13[%c0_53, %c0_54, %c0_55] : memref<1x1x32xf32, #tpu.memory_space<vmem>>, vector<1x1x32xf32>
    %146 = vector.shape_cast %145 : vector<1x1x32xf32> to vector<32xf32>
    %c0_56 = arith.constant 0 : index
    %c0_57 = arith.constant 0 : index
    %c0_58 = arith.constant 0 : index
    %147 = vector.load %arg14[%c0_56, %c0_57, %c0_58] : memref<1x1x32xf32, #tpu.memory_space<vmem>>, vector<1x1x32xf32>
    %148 = vector.shape_cast %147 : vector<1x1x32xf32> to vector<32xf32>
    %c0_59 = arith.constant 0 : index
    %c0_60 = arith.constant 0 : index
    %c0_61 = arith.constant 0 : index
    %149 = vector.load %arg15[%c0_59, %c0_60, %c0_61] : memref<1x32x128xbf16, #tpu.memory_space<vmem>>, vector<1x32x128xbf16>
    %150 = vector.shape_cast %149 : vector<1x32x128xbf16> to vector<32x128xbf16>
    %c0_62 = arith.constant 0 : index
    %c0_63 = arith.constant 0 : index
    %c0_64 = arith.constant 0 : index
    %151 = vector.load %arg16[%c0_62, %c0_63, %c0_64] : memref<1x1x128xf32, #tpu.memory_space<vmem>>, vector<1x1x128xf32>
    %152 = vector.shape_cast %151 : vector<1x1x128xf32> to vector<128xf32>
    %c0_65 = arith.constant 0 : index
    %c0_66 = arith.constant 0 : index
    %c0_67 = arith.constant 0 : index
    %153 = vector.load %arg17[%c0_65, %c0_66, %c0_67] : memref<1x128x32xbf16, #tpu.memory_space<vmem>>, vector<1x128x32xbf16>
    %154 = vector.shape_cast %153 : vector<1x128x32xbf16> to vector<128x32xbf16>
    %c0_68 = arith.constant 0 : index
    %c0_69 = arith.constant 0 : index
    %c0_70 = arith.constant 0 : index
    %155 = vector.load %arg18[%c0_68, %c0_69, %c0_70] : memref<1x1x32xf32, #tpu.memory_space<vmem>>, vector<1x1x32xf32>
    %156 = vector.shape_cast %155 : vector<1x1x32xf32> to vector<32xf32>
    %c0_i32_71 = arith.constant 0 : i32
    %c2_i32 = arith.constant 2 : i32
    %157 = arith.addi %c0_i32_71, %c2_i32 : i32
    %c1_i32_72 = arith.constant 1 : i32
    scf.for %arg24 = %c0_i32_71 to %157 step %c1_i32_72  : i32 {
      %c1_i32_76 = arith.constant 1 : i32
      %161 = arith.muli %arg24, %c1_i32_76 : i32
      %162 = tpu.assume_multiple %161, 1 : i32
      %163 = arith.index_cast %162 : i32 to index
      %c0_77 = arith.constant 0 : index
      %c0_78 = arith.constant 0 : index
      %164 = vector.load %arg23[%163, %c0_77, %c0_78] : memref<2x8x32xf32, #tpu.memory_space<vmem>>, vector<1x8x32xf32>
      %cst_79 = arith.constant dense<0.000000e+00> : vector<1x8xf32>
      %165 = vector.multi_reduction <add>, %164, %cst_79 [2] : vector<1x8x32xf32> to vector<1x8xf32>
      %166 = vector.shape_cast %165 : vector<1x8xf32> to vector<1x8x1xf32>
      %cst_80 = arith.constant 3.200000e+01 : f32
      %167 = vector.broadcast %cst_80 : f32 to vector<1x8x1xf32>
      %168 = arith.divf %166, %167 : vector<1x8x1xf32>
      %169 = vector.broadcast %168 : vector<1x8x1xf32> to vector<1x8x32xf32>
      %170 = arith.subf %164, %169 : vector<1x8x32xf32>
      %171 = arith.mulf %170, %170 : vector<1x8x32xf32>
      %cst_81 = arith.constant dense<0.000000e+00> : vector<1x8xf32>
      %172 = vector.multi_reduction <add>, %171, %cst_81 [2] : vector<1x8x32xf32> to vector<1x8xf32>
      %173 = vector.shape_cast %172 : vector<1x8xf32> to vector<1x8x1xf32>
      %cst_82 = arith.constant 3.200000e+01 : f32
      %174 = vector.broadcast %cst_82 : f32 to vector<1x8x1xf32>
      %175 = arith.divf %173, %174 : vector<1x8x1xf32>
      %176 = vector.broadcast %168 : vector<1x8x1xf32> to vector<1x8x32xf32>
      %177 = arith.subf %164, %176 : vector<1x8x32xf32>
      %cst_83 = arith.constant 9.99999974E-6 : f32
      %178 = vector.broadcast %cst_83 : f32 to vector<1x8x1xf32>
      %179 = arith.addf %175, %178 : vector<1x8x1xf32>
      %180 = math.rsqrt %179 : vector<1x8x1xf32>
      %181 = vector.broadcast %180 : vector<1x8x1xf32> to vector<1x8x32xf32>
      %182 = arith.mulf %177, %181 : vector<1x8x32xf32>
      %183 = vector.shape_cast %146 : vector<32xf32> to vector<1x1x32xf32>
      %184 = vector.broadcast %183 : vector<1x1x32xf32> to vector<1x8x32xf32>
      %185 = arith.mulf %182, %184 : vector<1x8x32xf32>
      %186 = vector.shape_cast %148 : vector<32xf32> to vector<1x1x32xf32>
      %187 = vector.broadcast %186 : vector<1x1x32xf32> to vector<1x8x32xf32>
      %188 = arith.addf %185, %187 : vector<1x8x32xf32>
      %189 = vector.shape_cast %188 : vector<1x8x32xf32> to vector<8x32xf32>
      %190 = arith.truncf %189 : vector<8x32xf32> to vector<8x32xbf16>
      %cst_84 = arith.constant dense<0.000000e+00> : vector<8x128xf32>
      %191 = tpu.matmul %190, %150, %cst_84 {dimension_numbers = #tpu.dot_dimension_numbers<[1], [0], [0], [1], [0, 0, 1, 1], [], []>} : vector<8x32xbf16>, vector<32x128xbf16>, vector<8x128xf32> -> vector<8x128xf32>
      %192 = vector.shape_cast %152 : vector<128xf32> to vector<1x128xf32>
      %193 = vector.broadcast %192 : vector<1x128xf32> to vector<8x128xf32>
      %194 = arith.addf %191, %193 : vector<8x128xf32>
      %cst_85 = arith.constant 1.702000e+00 : f32
      %195 = vector.broadcast %cst_85 : f32 to vector<8x128xf32>
      %196 = arith.mulf %195, %194 : vector<8x128xf32>
      %197 = arith.negf %196 : vector<8x128xf32>
      %198 = math.exp %197 : vector<8x128xf32>
      %cst_86 = arith.constant 1.000000e+00 : f32
      %199 = vector.broadcast %cst_86 : f32 to vector<8x128xf32>
      %200 = arith.addf %199, %198 : vector<8x128xf32>
      %201 = arith.divf %199, %200 : vector<8x128xf32>
      %202 = arith.mulf %194, %201 : vector<8x128xf32>
      %203 = arith.truncf %202 : vector<8x128xf32> to vector<8x128xbf16>
      %cst_87 = arith.constant dense<0.000000e+00> : vector<8x32xf32>
      %204 = tpu.matmul %203, %154, %cst_87 {dimension_numbers = #tpu.dot_dimension_numbers<[1], [0], [0], [1], [0, 0, 1, 1], [], []>} : vector<8x128xbf16>, vector<128x32xbf16>, vector<8x32xf32> -> vector<8x32xf32>
      %205 = vector.shape_cast %156 : vector<32xf32> to vector<1x32xf32>
      %206 = vector.broadcast %205 : vector<1x32xf32> to vector<8x32xf32>
      %207 = arith.addf %204, %206 : vector<8x32xf32>
      %208 = vector.shape_cast %207 : vector<8x32xf32> to vector<1x8x32xf32>
      %209 = arith.addf %164, %208 : vector<1x8x32xf32>
      %210 = arith.index_cast %162 : i32 to index
      %c0_88 = arith.constant 0 : index
      %c0_89 = arith.constant 0 : index
      %211 = vector.load %arg23[%210, %c0_88, %c0_89] : memref<2x8x32xf32, #tpu.memory_space<vmem>>, vector<1x8x32xf32>
      tpu.vector_store %arg23[%210, %c0_88, %c0_89], %209 {strides = array<i32>} : memref<2x8x32xf32, #tpu.memory_space<vmem>>, vector<1x8x32xf32>,
    }
    %c2_i32_73 = arith.constant 2 : i32
    %c1_i32_74 = arith.constant 1 : i32
    %158 = arith.cmpi eq, %arg1, %c1_i32_74 : i32
    %159 = arith.extui %158 : i1 to i32
    %c0_i32_75 = arith.constant 0 : i32
    %160 = arith.cmpi ne, %159, %c0_i32_75 : i32
    scf.if %160 {
      %c2_i32_76 = arith.constant 2 : i32
      %161 = arith.muli %arg0, %c2_i32_76 : i32
      %c0_i32_77 = arith.constant 0 : i32
      %162 = arith.addi %161, %c0_i32_77 : i32
      %163 = arith.index_cast %162 : i32 to index
      %164 = memref.load %arg2[%163] : memref<4xi32, #tpu.memory_space<smem>>
      %c0_78 = arith.constant 0 : index
      %165 = arith.index_cast %164 : i32 to index
      %c0_79 = arith.constant 0 : index
      %166 = vector.load %arg23[%c0_78, %165, %c0_79] : memref<2x8x32xf32, #tpu.memory_space<vmem>>, vector<1x1x32xf32>
      %167 = vector.shape_cast %166 : vector<1x1x32xf32> to vector<1x32xf32>
      %c2_i32_80 = arith.constant 2 : i32
      %168 = arith.muli %arg0, %c2_i32_80 : i32
      %c1_i32_81 = arith.constant 1 : i32
      %169 = arith.addi %168, %c1_i32_81 : i32
      %170 = arith.index_cast %169 : i32 to index
      %171 = memref.load %arg2[%170] : memref<4xi32, #tpu.memory_space<smem>>
      %c1 = arith.constant 1 : index
      %172 = arith.index_cast %171 : i32 to index
      %c0_82 = arith.constant 0 : index
      %173 = vector.load %arg23[%c1, %172, %c0_82] : memref<2x8x32xf32, #tpu.memory_space<vmem>>, vector<1x1x32xf32>
      %174 = vector.shape_cast %173 : vector<1x1x32xf32> to vector<1x32xf32>
      %175 = tpu.concatenate %167, %174 in 0 : vector<1x32xf32>, vector<1x32xf32> -> vector<2x32xf32>
      %c0_83 = arith.constant 0 : index
      %c0_84 = arith.constant 0 : index
      %176 = vector.load %arg19[%c0_83, %c0_84] : memref<1x32xf32, #tpu.memory_space<vmem>>, vector<1x32xf32>
      %177 = vector.shape_cast %176 : vector<1x32xf32> to vector<32xf32>
      %c0_85 = arith.constant 0 : index
      %c0_86 = arith.constant 0 : index
      %178 = vector.load %arg20[%c0_85, %c0_86] : memref<1x32xf32, #tpu.memory_space<vmem>>, vector<1x32xf32>
      %179 = vector.shape_cast %178 : vector<1x32xf32> to vector<32xf32>
      %cst_87 = arith.constant dense<0.000000e+00> : vector<2xf32>
      %180 = vector.multi_reduction <add>, %175, %cst_87 [1] : vector<2x32xf32> to vector<2xf32>
      %181 = vector.shape_cast %180 : vector<2xf32> to vector<2x1xf32>
      %cst_88 = arith.constant 3.200000e+01 : f32
      %182 = vector.broadcast %cst_88 : f32 to vector<2x1xf32>
      %183 = arith.divf %181, %182 : vector<2x1xf32>
      %184 = vector.broadcast %183 : vector<2x1xf32> to vector<2x32xf32>
      %185 = arith.subf %175, %184 : vector<2x32xf32>
      %186 = arith.mulf %185, %185 : vector<2x32xf32>
      %cst_89 = arith.constant dense<0.000000e+00> : vector<2xf32>
      %187 = vector.multi_reduction <add>, %186, %cst_89 [1] : vector<2x32xf32> to vector<2xf32>
      %188 = vector.shape_cast %187 : vector<2xf32> to vector<2x1xf32>
      %cst_90 = arith.constant 3.200000e+01 : f32
      %189 = vector.broadcast %cst_90 : f32 to vector<2x1xf32>
      %190 = arith.divf %188, %189 : vector<2x1xf32>
      %191 = vector.broadcast %183 : vector<2x1xf32> to vector<2x32xf32>
      %192 = arith.subf %175, %191 : vector<2x32xf32>
      %cst_91 = arith.constant 9.99999974E-6 : f32
      %193 = vector.broadcast %cst_91 : f32 to vector<2x1xf32>
      %194 = arith.addf %190, %193 : vector<2x1xf32>
      %195 = math.rsqrt %194 : vector<2x1xf32>
      %196 = vector.broadcast %195 : vector<2x1xf32> to vector<2x32xf32>
      %197 = arith.mulf %192, %196 : vector<2x32xf32>
      %198 = vector.shape_cast %177 : vector<32xf32> to vector<1x32xf32>
      %199 = vector.broadcast %198 : vector<1x32xf32> to vector<2x32xf32>
      %200 = arith.mulf %197, %199 : vector<2x32xf32>
      %201 = vector.shape_cast %179 : vector<32xf32> to vector<1x32xf32>
      %202 = vector.broadcast %201 : vector<1x32xf32> to vector<2x32xf32>
      %203 = arith.addf %200, %202 : vector<2x32xf32>
      %204 = arith.truncf %203 : vector<2x32xf32> to vector<2x32xbf16>
      %c0_92 = arith.constant 0 : index
      %c0_93 = arith.constant 0 : index
      %205 = vector.load %arg21[%c0_92, %c0_93] : memref<32x32xbf16, #tpu.memory_space<vmem>>, vector<32x32xbf16>
      %cst_94 = arith.constant dense<0.000000e+00> : vector<2x32xf32>
      %206 = tpu.matmul %204, %205, %cst_94 {dimension_numbers = #tpu.dot_dimension_numbers<[1], [0], [0], [1], [0, 0, 1, 1], [], []>} : vector<2x32xbf16>, vector<32x32xbf16>, vector<2x32xf32> -> vector<2x32xf32>
      %c0_95 = arith.constant 0 : index
      %c0_96 = arith.constant 0 : index
      %c0_97 = arith.constant 0 : index
      %207 = vector.load %arg22[%c0_95, %c0_96, %c0_97] : memref<1x2x32xf32, #tpu.memory_space<vmem>>, vector<1x2x32xf32>
      %208 = vector.shape_cast %207 : vector<1x2x32xf32> to vector<2x32xf32>
      %209 = vector.shape_cast %206 : vector<2x32xf32> to vector<1x2x32xf32>
      tpu.vector_store %arg22[%c0_95, %c0_96, %c0_97], %209 {strides = array<i32>} : memref<1x2x32xf32, #tpu.memory_space<vmem>>, vector<1x2x32xf32>,
    } else {
    }
    return
  }
  func.func @transform_0(%arg0: i32, %arg1: i32, %arg2: memref<4xi32, #tpu.memory_space<smem>>) -> (i32, i32, i32) {
    %c0_i32 = arith.constant 0 : i32
    %c0_i32_0 = arith.constant 0 : i32
    %c0_i32_1 = arith.constant 0 : i32
    return %arg0, %c0_i32, %c0_i32_0 : i32, i32, i32
  }
  func.func @transform_1(%arg0: i32, %arg1: i32, %arg2: memref<4xi32, #tpu.memory_space<smem>>) -> (i32, i32, i32) {
    %c0_i32 = arith.constant 0 : i32
    %c0_i32_0 = arith.constant 0 : i32
    %c0_i32_1 = arith.constant 0 : i32
    return %arg0, %c0_i32, %c0_i32_0 : i32, i32, i32
  }
  func.func @transform_2(%arg0: i32, %arg1: i32, %arg2: memref<4xi32, #tpu.memory_space<smem>>) -> i32 {
    %c0_i32 = arith.constant 0 : i32
    %c0_i32_0 = arith.constant 0 : i32
    return %c0_i32 : i32
  }
  func.func @transform_3(%arg0: i32, %arg1: i32, %arg2: memref<4xi32, #tpu.memory_space<smem>>) -> (i32, i32) {
    %c0_i32 = arith.constant 0 : i32
    %c0_i32_0 = arith.constant 0 : i32
    %c0_i32_1 = arith.constant 0 : i32
    return %c0_i32, %c0_i32_0 : i32, i32
  }
  func.func @transform_4(%arg0: i32, %arg1: i32, %arg2: memref<4xi32, #tpu.memory_space<smem>>) -> (i32, i32, i32) {
    %c0_i32 = arith.constant 0 : i32
    %c0_i32_0 = arith.constant 0 : i32
    %c0_i32_1 = arith.constant 0 : i32
    return %arg1, %c0_i32, %c0_i32_0 : i32, i32, i32
  }
  func.func @transform_5(%arg0: i32, %arg1: i32, %arg2: memref<4xi32, #tpu.memory_space<smem>>) -> (i32, i32, i32) {
    %c0_i32 = arith.constant 0 : i32
    %c0_i32_0 = arith.constant 0 : i32
    %c0_i32_1 = arith.constant 0 : i32
    return %arg1, %c0_i32, %c0_i32_0 : i32, i32, i32
  }
  func.func @transform_6(%arg0: i32, %arg1: i32, %arg2: memref<4xi32, #tpu.memory_space<smem>>) -> (i32, i32, i32) {
    %c0_i32 = arith.constant 0 : i32
    %c0_i32_0 = arith.constant 0 : i32
    %c0_i32_1 = arith.constant 0 : i32
    return %arg1, %c0_i32, %c0_i32_0 : i32, i32, i32
  }
  func.func @transform_7(%arg0: i32, %arg1: i32, %arg2: memref<4xi32, #tpu.memory_space<smem>>) -> (i32, i32, i32) {
    %c0_i32 = arith.constant 0 : i32
    %c0_i32_0 = arith.constant 0 : i32
    %c0_i32_1 = arith.constant 0 : i32
    return %arg1, %c0_i32, %c0_i32_0 : i32, i32, i32
  }
  func.func @transform_8(%arg0: i32, %arg1: i32, %arg2: memref<4xi32, #tpu.memory_space<smem>>) -> (i32, i32, i32) {
    %c0_i32 = arith.constant 0 : i32
    %c0_i32_0 = arith.constant 0 : i32
    %c0_i32_1 = arith.constant 0 : i32
    return %arg1, %c0_i32, %c0_i32_0 : i32, i32, i32
  }
  func.func @transform_9(%arg0: i32, %arg1: i32, %arg2: memref<4xi32, #tpu.memory_space<smem>>) -> (i32, i32, i32) {
    %c0_i32 = arith.constant 0 : i32
    %c0_i32_0 = arith.constant 0 : i32
    %c0_i32_1 = arith.constant 0 : i32
    return %arg1, %c0_i32, %c0_i32_0 : i32, i32, i32
  }
  func.func @transform_10(%arg0: i32, %arg1: i32, %arg2: memref<4xi32, #tpu.memory_space<smem>>) -> (i32, i32, i32) {
    %c0_i32 = arith.constant 0 : i32
    %c0_i32_0 = arith.constant 0 : i32
    %c0_i32_1 = arith.constant 0 : i32
    return %arg1, %c0_i32, %c0_i32_0 : i32, i32, i32
  }
  func.func @transform_11(%arg0: i32, %arg1: i32, %arg2: memref<4xi32, #tpu.memory_space<smem>>) -> (i32, i32, i32) {
    %c0_i32 = arith.constant 0 : i32
    %c0_i32_0 = arith.constant 0 : i32
    %c0_i32_1 = arith.constant 0 : i32
    return %arg1, %c0_i32, %c0_i32_0 : i32, i32, i32
  }
  func.func @transform_12(%arg0: i32, %arg1: i32, %arg2: memref<4xi32, #tpu.memory_space<smem>>) -> (i32, i32, i32) {
    %c0_i32 = arith.constant 0 : i32
    %c0_i32_0 = arith.constant 0 : i32
    %c0_i32_1 = arith.constant 0 : i32
    return %arg1, %c0_i32, %c0_i32_0 : i32, i32, i32
  }
  func.func @transform_13(%arg0: i32, %arg1: i32, %arg2: memref<4xi32, #tpu.memory_space<smem>>) -> (i32, i32, i32) {
    %c0_i32 = arith.constant 0 : i32
    %c0_i32_0 = arith.constant 0 : i32
    %c0_i32_1 = arith.constant 0 : i32
    return %arg1, %c0_i32, %c0_i32_0 : i32, i32, i32
  }
  func.func @transform_14(%arg0: i32, %arg1: i32, %arg2: memref<4xi32, #tpu.memory_space<smem>>) -> (i32, i32, i32) {
    %c0_i32 = arith.constant 0 : i32
    %c0_i32_0 = arith.constant 0 : i32
    %c0_i32_1 = arith.constant 0 : i32
    return %arg1, %c0_i32, %c0_i32_0 : i32, i32, i32
  }
  func.func @transform_15(%arg0: i32, %arg1: i32, %arg2: memref<4xi32, #tpu.memory_space<smem>>) -> (i32, i32, i32) {
    %c0_i32 = arith.constant 0 : i32
    %c0_i32_0 = arith.constant 0 : i32
    %c0_i32_1 = arith.constant 0 : i32
    return %arg1, %c0_i32, %c0_i32_0 : i32, i32, i32
  }
  func.func @transform_16(%arg0: i32, %arg1: i32, %arg2: memref<4xi32, #tpu.memory_space<smem>>) -> (i32, i32) {
    %c0_i32 = arith.constant 0 : i32
    %c0_i32_0 = arith.constant 0 : i32
    %c0_i32_1 = arith.constant 0 : i32
    return %c0_i32, %c0_i32_0 : i32, i32
  }
  func.func @transform_17(%arg0: i32, %arg1: i32, %arg2: memref<4xi32, #tpu.memory_space<smem>>) -> (i32, i32) {
    %c0_i32 = arith.constant 0 : i32
    %c0_i32_0 = arith.constant 0 : i32
    %c0_i32_1 = arith.constant 0 : i32
    return %c0_i32, %c0_i32_0 : i32, i32
  }
  func.func @transform_18(%arg0: i32, %arg1: i32, %arg2: memref<4xi32, #tpu.memory_space<smem>>) -> (i32, i32) {
    %c0_i32 = arith.constant 0 : i32
    %c0_i32_0 = arith.constant 0 : i32
    %c0_i32_1 = arith.constant 0 : i32
    return %c0_i32, %c0_i32_0 : i32, i32
  }
  func.func @transform_19(%arg0: i32, %arg1: i32, %arg2: memref<4xi32, #tpu.memory_space<smem>>) -> (i32, i32, i32) {
    %c0_i32 = arith.constant 0 : i32
    %c0_i32_0 = arith.constant 0 : i32
    %c0_i32_1 = arith.constant 0 : i32
    return %arg0, %c0_i32, %c0_i32_0 : i32, i32, i32
  }
}

</mosaic_0001>

<bundles_post_ra>
// kernel: tpu_custom_call.1
= control target key start
LH: loop header
LB: loop body
LE: loop exit
PB: predicated region body
PF: predicated region fallthrough
CT: control target
= control target key end

     0   :  { %s2722_s25 = smov [#allocation4]   ;;  %s3438_s0 = inlined_call_operand.hbm [shape: s32[4], index: 0, kind: input, shape index: {}]   ;;  %s3439_s1 = inlined_call_operand.vmem [shape: f32[4,8,32], index: 1, kind: input, shape index: {}]   ;;  %s3440_s2 = inlined_call_operand.vmem [shape: f32[4,4,32], index: 2, kind: input, shape index: {}]   ;;  %s3441_s3 = inlined_call_operand.<no memory space> [shape: f32[1], index: 3, kind: input, shape index: {}]   ;;  %s3442_s4 = inlined_call_operand.hbm [shape: f32[8,8], index: 4, kind: input, shape index: {}]   ;;  %s3443_s5 = inlined_call_operand.vmem [shape: f32[2,1,32], index: 5, kind: input, shape index: {}]   ;;  %s3444_s6 = inlined_call_operand.vmem [shape: f32[2,1,32], index: 6, kind: input, shape index: {}]   ;;  %s3445_s7 = inlined_call_operand.vmem [shape: bf16[2,32,96], index: 7, kind: input, shape index: {}]   ;;  %s3446_s8 = inlined_call_operand.vmem [shape: f32[2,1,96], index: 8, kind: input, shape index: {}]   ;;  %s3447_s9 = inlined_call_operand.vmem [shape: bf16[2,32,32], index: 9, kind: input, shape index: {}]   ;;  %s3448_s10 = inlined_call_operand.vmem [shape: f32[2,1,32], index: 10, kind: input, shape index: {}]   ;;  %s3449_s11 = inlined_call_operand.vmem [shape: f32[2,1,32], index: 11, kind: input, shape index: {}]   ;;  %s3450_s12 = inlined_call_operand.hbm [shape: f32[2,1,32], index: 12, kind: input, shape index: {}]   ;;  %s3451_s13 = inlined_call_operand.vmem [shape: bf16[2,32,128], index: 13, kind: input, shape index: {}]   ;;  %s3452_s14 = inlined_call_operand.vmem [shape: f32[2,1,128], index: 14, kind: input, shape index: {}]   ;;  %s3453_s15 = inlined_call_operand.vmem [shape: bf16[2,128,32], index: 15, kind: input, shape index: {}]   ;;  %s3454_s16 = inlined_call_operand.vmem [shape: f32[2,1,32], index: 16, kind: input, shape index: {}]   ;;  %s3455_s17 = inlined_call_operand.vmem [shape: f32[1,32], index: 17, kind: input, shape index: {}]   ;;  %s3456_s18 = inlined_call_operand.vmem [shape: f32[1,32], index: 18, kind: input, shape index: {}]   ;;  %s3457_s19 = inlined_call_operand.vmem [shape: bf16[32,32], index: 19, kind: input, shape index: {}]   ;;  %s3458_s20 = inlined_call_operand.hbm [shape: f32[2,2,32], index: 20, kind: output, shape index: {}]  }
   0x1   :  { %3479 = sst [smem:[#allocation33_spill]] %s3438_s0 }
   0x2   :  { %3480 = sst [smem:[#allocation34_spill]] %s3439_s1 }
   0x3   :  { %3481 = sst [smem:[#allocation35_spill]] %s3440_s2 }
   0x4   :  { %3482 = sst [smem:[#allocation36_spill]] %s3441_s3 }
   0x5   :  { %3483 = sst [smem:[#allocation37_spill]] %s3442_s4 }
   0x6   :  { %3484 = sst [smem:[#allocation38_spill]] %s3445_s7 }
   0x7   :  { %3485 = sst [smem:[#allocation39_spill]] %s3447_s9 }
   0x8   :  { %3486 = sst [smem:[#allocation40_spill]] %s3448_s10 }
   0x9   :  { %3487 = sst [smem:[#allocation41_spill]] %s3449_s11 }
   0xa   :  { %3488 = sst [smem:[#allocation42_spill]] %s3450_s12 }
   0xb   :  { %3489 = sst [smem:[#allocation43_spill]] %s3451_s13 }
   0xc   :  { %3490 = sst [smem:[#allocation44_spill]] %s3452_s14 }
   0xd   :  { %3491 = sst [smem:[#allocation45_spill]] %s3453_s15 }
   0xe   :  { %3492 = sst [smem:[#allocation46_spill]] %s3454_s16 }
   0xf   :  { %3493 = sst [smem:[#allocation47_spill]] %s3455_s17 }
  0x10   :  { %3494 = sst [smem:[#allocation48_spill]] %s3456_s18 }
  0x11   :  { %3495 = sst [smem:[#allocation49_spill]] %s3457_s19 }
  0x12   :  { %3496 = sst [smem:[#allocation50_spill]] %s3458_s20 }
  0x13   :  { %s3497_s23 = sld [smem:[#allocation33_spill]] }
  0x14   :  { %s3498_s15 = sld [smem:[#allocation36_spill]] }
  0x19   :  { %s26_s14 = sshll.u32 %s3497_s23, 4  ;;  %s27_s14 = int_to_ptr.hbm [resolvable:$true] %s26_s14 }
  0x1a   :  { %30 = sst [smem:[#allocation5]] %s3498_s15 }
  0x1b   :  { %29 = dma.hbm_to_smem %s27_s14, 16, %s2722_s25, [#allocation3] }
  0x1c   :  { %2660 = dma.done.wait [#allocation3], 16 }
  0x1d   :  { %2661 = vsyncadd [#allocation3], 4294967280 }
  0x1e   :  { %33 = sfence }
  0x1f   :  { %34 = vsyncpa [#allocation7], 0 }
  0x20   :  { %35 = vsyncpa [#allocation10], 0 }
  0x21   :  { %37 = vsyncpa [#allocation10 + $0x1], 0 }
  0x22   :  { %38 = vsyncpa [#allocation8], 0 }
  0x23   :  { %40 = vsyncpa [#allocation8 + $0x1], 0  ;;  %s2850_s3 = smov 0   ;;  %s2852_s26 = smov 0  }
  0x24   :  { %s2854_s27 = smov 0   ;;  %s2856_s28 = smov 0  }
  0x25   :  { %s2858_s15 = smov 0   ;;  %s2860_s4 = smov 0  }
  0x26   :  { %s2862_s14 = smov 0   ;;  %s2864_s29 = smov 0  }
  0x27   :  { %s2866_s30 = smov 0   ;;  %s2868_s0 = smov 0  }
  0x28   :  { %s2870_s21 = smov 0  }
  0x29 LB: > { %3499 = sst [smem:[#allocation16_spill]] %s2676_s3  ;;  %s2186_s1 = sadd.s32 4294967295, %s2716_s21   ;;  %s2716_s21 = sphi %s2870_s21, %s46_s21   ;;  %s2712_s0 = sphi %s2868_s0, %s3565_s0   ;;  %s2708_s30 = sphi %s2866_s30, %s3564_s30   ;;  %s2704_s29 = sphi %s2864_s29, %s3563_s29   ;;  %s2700_s14 = sphi %s2862_s14, %s3562_s14   ;;  %s2696_s4 = sphi %s2860_s4, %s3561_s4   ;;  %s2692_s15 = sphi %s2858_s15, %s3560_s15   ;;  %s2688_s28 = sphi %s2856_s28, %s3559_s28   ;;  %s2684_s27 = sphi %s2854_s27, %s3558_s27   ;;  %s2680_s26 = sphi %s2852_s26, %s3557_s26   ;;  %s2676_s3 = sphi %s2850_s3, %s3556_s3  }
  0x2a   : > { %3500 = sst [smem:[#allocation17_spill]] %s2680_s26  ;;  %s2187_s22 = sadd.s32 4294967294, %s2716_s21  }
  0x2b   : > { %3501 = sst [smem:[#allocation18_spill]] %s2684_s27  ;;  %p354_p0 = scmp.ne.s32.totalorder %s2692_s15, %s2688_s28 }
  0x2c   : > { %3502 = sst [smem:[#allocation19_spill]] %s2692_s15  ;;  %p2906_p1 = scmp.eq.s32.totalorder %s2186_s1, 0 }
  0x2d   : > { %3503 = sst [smem:[#allocation20_spill]] %s2696_s4  ;;  %p544_p2 = scmp.ne.s32.totalorder %s2684_s27, %s2680_s26 }
  0x2e   : > { %3504 = sst [smem:[#allocation21_spill]] %s2708_s30  ;;  %p2914_p3 = por %p2906_p1, %p354_p0 }
  0x2f   : > { %3505 = sst [smem:[#allocation22_spill]] %s2712_s0  ;;  %p545_p4 = scmp.eq.s32.totalorder %s2186_s1, 3 }
  0x30   : > { %3506 = sst [smem:[#allocation23_spill]] %s2716_s21  ;;  %p550_p5 = scmp.ne.s32.totalorder %s2680_s26, %s2676_s3 }
  0x31   : > { %p551_p6 = scmp.eq.s32.totalorder %s2187_s22, 3  ;;  %p2920_p7 = por %p545_p4, %p544_p2 }
  0x32   : > { %p2188_p8 = scmp.ge.s32.totalorder %s2716_s21, 1  ;;  %p558_p10 = scmp.lt.s32.totalorder %s2716_s21, 5 }
  0x33   : > { %s3509_s2 = scalar_select %p2920_p7, 1, 0 }
  0x34   : > { %p2925_p9 = por %p551_p6, %p550_p5  ;;  %s3513_s1 = sld [smem:[#allocation37_spill]] }
  0x35   : > { %3510 = sst [smem:[#allocation24_spill]] %s3509_s2  ;;  %p2933_p11 = pnand %p2188_p8, %p558_p10 }
  0x36   : > { %s3511_s25 = scalar_select %p2925_p9, 1, 0 }
  0x37   : > { %p2329_p12 = pneg %p2933_p11  ;;  %s2723_s2 = smov [#allocation6]  }
  0x38   : > { %3512 = sst [smem:[#allocation25_spill]] %s3511_s25  ;;  %s575_s18 = sshll.u32 %s2723_s2, 4  ;;  %s576_s18 = int_to_ptr.vmem [resolvable:$true] %s575_s18 }
  0x39   : > { %p2330_p13 = pnand %p2329_p12, %p2906_p1  ;;  %s55_s20 = sadd.s32 1, %s2708_s30 }
  0x3a   : > { %s573_s3 = sshll.u32 %s3513_s1, 4  ;;  %p56_p0 = scmp.ge.s32.totalorder %s55_s20, 2  ;;  %s574_s3 = int_to_ptr.hbm [resolvable:$true] %s573_s3 }
  0x3b   : > { %2332 = dma.hbm_to_vmem [thread:$0]  (!%p2330_p13), %s574_s3, 128, %s576_s18, [#allocation7]  }
  0x3c   : > { %s58_s28 = sadd.s32 1, %s2712_s0  ;;  %s341_s1 = sadd.s32 1, %s2696_s4 }
  0x3d   : > { %p348_p2 = scmp.ne.s32.totalorder %s2696_s4, %s2692_s15  ;;  %s3567_s20 = smov (%p56_p0, %s55_s20), 0 }
  0x3e   : > { %3515 = sst [smem:[#allocation26_spill]] %s3567_s20  ;;  %s3569_s28 = smov (!%p56_p0, %s58_s28), %s2712_s0 }
  0x3f   : > { %s338_s2 = ssub.s32 %s2708_s30, %s3567_s20  ;;  %p349_p4 = scmp.eq.s32.totalorder %s2716_s21, 0 }
  0x40   : > { %p60_p5 = scmp.ge.s32.totalorder %s3569_s28, 2  ;;  %p339_p6 = scmp.eq.s32.totalorder %s338_s2, 0 }
  0x41   : > { %s534_s25 = sadd.s32 1, %s2684_s27  ;;  %p2953_p8 = por %p349_p4, %p348_p2 }
  0x42   : > { %s3571_s28 = smov (%p60_p5, %s3569_s28), 0  ;;  %s659_s19 = sand.u32 1, %s2696_s4  }
  0x43   : > { %3517 = sst [smem:[#allocation27_spill]] %s3571_s28  ;;  %s531_s17 = ssub.s32 %s2712_s0, %s3571_s28 }
  0x44   : > { %s2960_s3 = scalar_select %p339_p6, %s2696_s4, %s341_s1  }
  0x45   : > { %p532_p10 = scmp.eq.s32.totalorder %s531_s17, 0  ;;  %p2342_p12 = scmp.lt.s32.totalorder %s2716_s21, 4 }
  0x46   : > { %3518 = sst [smem:[#allocation28_spill]] %s2960_s3  ;;  %s662_s10 = scalar_lea.vmem [#allocation9], %s659_s19 }
  0x47   : > { %s3519_s12 = sld [smem:[#allocation42_spill]]  ;;  %s669_s9 = sshll.u32 %s662_s10, 4  ;;  %s670_s9 = int_to_ptr.vmem [resolvable:$true] %s669_s9 }
  0x48   : > { %s2971_s2 = scalar_select %p532_p10, %s2684_s27, %s534_s25  }
  0x49   : > { %p2334_p13 = pnand %p2342_p12, %p2953_p8  ;;  %s660_s7 = scalar_lea.sflag [#allocation10], %s659_s19 }
  0x4a   : > { %3520 = sst [smem:[#allocation29_spill]] %s2971_s2 }
  0x4b   : > { %706 = sbr.rel (%p2933_p11) target bundleno = 2558 (0x9fe), region = 96 }
  0x4d   : > { %s665_s13 = scalar_lea.hbm %s3519_s12, %s2708_s30 }
  0x4e   : > { %s667_s11 = sshll.u32 %s665_s13, 4  ;;  %s668_s11 = int_to_ptr.hbm [resolvable:$true] %s667_s11 }
  0x4f   : > { %2336 = dma.hbm_to_vmem [thread:$0]  (!%p2334_p13), %s668_s11, 16, %s670_s9, %s660_s7  }
  0x50   : > { %2663 = dma.done.wait (%p2906_p1), [#allocation7], 128  }
  0x51   : > { %2665 = vsyncadd (%p2906_p1), [#allocation7], 4294967168  ;;  %s713_s13 = sand.u32 1, %s2692_s15  }
  0x52   : > { %s714_s16 = scalar_lea.sflag [#allocation10], %s713_s13  ;;  %s2982_s10 = scalar_lea.vmem [#allocation9], %s713_s13 }
  0x53   : > { %3521 = sst [smem:[#allocation30_spill]] %s2982_s10 }
  0x54   : > { %2667 = dma.done.wait (%p2914_p3), %s714_s16, 16  }
  0x55   : > { %2669 = vsyncadd (%p2914_p3), %s714_s16, 4294967280  ;;  %s3466_s7 = sand.u32 1, %s2680_s26   ;;  %s2990_s9 = sshll.u32 %s2704_s29, 1 }
  0x56   : > { %3522 = sst [smem:[#allocation31_spill]] %s2990_s9  ;;  %s2994_s11 = sshll.u32 %s3466_s7, 1 }
  0x57   : > { %p823_p1 = scmp.lt.s32.totalorder %s2990_s9, 3  ;;  %p834_p11 = scmp.lt.s32.totalorder %s2700_s14, 1 }
  0x58   : > { %s3523_s22 = sld [smem:[#allocation34_spill]]  ;;  %p2206_p3 = scmp.ne.s32.totalorder %s2700_s14, 0 }
  0x59   : > { %s824_s17 = scalar_select %p823_p1, %s2990_s9, 3 }
  0x5a   : > { %s3000_s19 = scalar_select %p834_p11, %s2700_s14, 1 }
  0x5b   : > { %s2195_s29 = sshll.u32 %s824_s17, 3  ;;  %s2197_s23 = sshll.u32 %s824_s17, 2 }
  0x5c   : > { %s3524_s13 = sld [smem:[#allocation35_spill]]  ;;  %s2301_s4 = sshll.u32 %s3000_s19, 4 }
  0x5d   : > { %s3526_s18 = sld [smem:[#allocation39_spill]]  ;;  %s2304_s1 = sshll.u32 %s3000_s19, 6 }
  0x5e   : > { %s826_s20 = scalar_lea.vmem %s3523_s22, %s2195_s29  ;;  %s3525_s29 = sld [smem:[#allocation38_spill]] }
  0x5f   : > { %s3529_s27 = sld [smem:[#allocation41_spill]] }
  0x60   : > { %s3530_s2 = sld [smem:[#allocation43_spill]] }
  0x61   : > { %s3532_s10 = sld [smem:[#allocation46_spill]] }
  0x62   : > { %s832_s16 = scalar_lea.vmem %s3524_s13, %s2197_s23  ;;  %s3533_s7 = sld [smem:[#allocation45_spill]] }
  0x63   : > { %s3029_s13 = scalar_lea.vmem %s3526_s18, %s2301_s4 }
  0x64   : > { %s3024_s22 = scalar_lea.vmem %s3525_s29, %s2301_s4  ;;  %3527 = sst [smem:[#allocation32_spill]] %s3029_s13 }
  0x65   : > { %s858_s21 = scalar_lea.vmem %s3529_s27, %s3000_s19  ;;  %s3531_s29 = sld [smem:[#allocation44_spill]] }
  0x66   : > { %s3042_s26 = scalar_lea.vmem %s3530_s2, %s2301_s4  ;;  %s821_s27 = scalar_lea.vmem [#allocation11], %s2994_s11 }
  0x67   : > { %s874_s13 = scalar_lea.vmem %s3532_s10, %s3000_s19  ;;  %879 = sbr.rel (%p2206_p3) target bundleno = 111 (0x6f), region = 108 }
  0x68   : > { %s3056_s30 = scalar_lea.vmem %s3533_s7, %s2304_s1 }
  0x6b   : > { %s866_s9 = scalar_lea.vmem %s3531_s29, %s3000_s19 }
  0x6c   : > { %v880_v0 = vld [vmem:[%s826_s20] sm:$0xff]  ;;  %vm882_vm0 = vcmask 261120   ;;  %v881_v1 = vld [vmem:[%s826_s20 + $0x8] sm:$0xff] }
  0x6d   : > { %883 = vst.msk [vmem:[#allocation2] sm:$0xff] %vm882_vm0, %v880_v0 }
  0x6e   : > { %884 = vst.msk [vmem:[#allocation2 + $0x8] sm:$0xff] %vm882_vm0, %v881_v1 }
  0x6f PF: > { %p2207_p0 = scmp.ne.s32.totalorder %s2700_s14, 1 }
  0x70   : > { %s889_s4 = sld [smem:[#allocation5]] (!%p2207_p0) }
  0x71   : > { %888 = sbr.rel (%p2207_p0) target bundleno = 127 (0x7f), region = 112 }
  0x76   : > { %v892_v2 = vld [vmem:[%s832_s16] sm:$0xf]  ;;  %v893_v3 = vld [vmem:[%s832_s16 + $0x4] sm:$0xf]  ;;  %v894_v5 = vstv %s889_s4  ;;  %s897_s3 = ssub.f32 1.0, %s889_s4  ;;  %vm903_vm1 = vcmask 257024  }
  0x77   : > { %v890_v4 = vld [vmem:[#allocation2 + $0x1] sm:$0xf]  ;;  %v891_v6 = vld [vmem:[#allocation2 + $0x9] sm:$0xf]  ;;  %v895_v7 = vmul.f32 %v894_v5, %v892_v2  ;;  %v896_v8 = vmul.f32 %v894_v5, %v893_v3 }
  0x78   : > { %v898_v9 = vstv %s897_s3 }
  0x79   : > { %v899_v10 = vmul.f32 %v898_v9, %v890_v4  ;;  %v900_v11 = vmul.f32 %v898_v9, %v891_v6 }
  0x7b   : > { %v901_v12 = vadd.f32 %v899_v10, %v895_v7  ;;  %v902_v13 = vadd.f32 %v900_v11, %v896_v8 }
  0x7d   : > { %904 = vst.msk [vmem:[#allocation2 + $0x1] sm:$0xf] %vm903_vm1, %v901_v12 }
  0x7e   : > { %905 = vst.msk [vmem:[#allocation2 + $0x9] sm:$0xf] %vm903_vm1, %v902_v13 }
  0x7f PF: > { %vm910_vm2 = vcmask 261120   ;;  %v2724_v18 = vmov 32.0   ;;  %v2306_v35 = vld [vmem:[%s3024_s22 + $0x8] sm:$0xff]  ;;  %v2305_v37 = vld [vmem:[%s3024_s22] sm:$0xff]  ;;  %s3534_s20 = scalar_lea.vmem %s3443_s5, %s3000_s19  ;;  %s3535_s0 = scalar_lea.vmem %s3444_s6, %s3000_s19  ;;  %vm1018_vm10 = vcmask 64512   ;;  %vm1117_vm11 = vcmask 1043456  }
  0x80   : > { %2462 = vrcp.f32 %v2724_v18  ;;  %1002 = vmatpush.bf16.msra.mxu0 %v2306_v35  ;;  %v2458_v56 = vld [vmem:[%s3534_s20] ss:$0 sm:$0xff]  ;;  %s3536_s24 = scalar_lea.vmem %s3446_s8, %s3000_s19  ;;  %s2725_s25 = smov 88  }
  0x81   : > { %v2459_v61 = vld [vmem:[%s3535_s0] ss:$0 sm:$0xff]  ;;  %s2726_s29 = smov 96   ;;  %s2727_s1 = smov 80  }
  0x82   : > { %v2460_v2 = vld [vmem:[%s3536_s24] ss:$0 sm:$0xff]  ;;  %s2728_s23 = smov 112   ;;  %s2729_s18 = smov 72  }
  0x83   : > { %s2730_s12 = smov 120   ;;  %s2731_s28 = smov 104  }
  0x84   : > { %v906_v14 = vld [vmem:[#allocation2] sm:$0xff]  ;;  %1003 = vmatpush.bf16.msra.mxu0 %v2305_v37  ;;  %s2732_s7 = smov 64   ;;  %s2733_s4 = smov 56  }
  0x85   : > { %v911_v15 = vsel %vm910_vm2, %v906_v14, 0.0  ;;  %v907_v16 = vld [vmem:[#allocation2 + $0x8] sm:$0xff]  ;;  %s2734_s3 = smov 40   ;;  %s2735_s2 = smov 48  }
  0x86   : > { %912 = vadd.xlane.f32.xlu0 %v911_v15  ;;  %v914_v17 = vsel %vm910_vm2, %v907_v16, 0.0  ;;  %v2463_v19 = vpop.eup %2462  ;;  %s2736_s10 = smov 8   ;;  %s2737_s20 = smov 16  }
  0x87   : > { %v918_v20 = vmul.f32 32.0, %v2463_v19  ;;  %vm922_vm3 = vweird.f32 %v2463_v19  ;;  %s3537_s16 = sld [smem:[#allocation32_spill]]  ;;  %s2738_s22 = smov 24  }
  0x88   : > { %s3538_s0 = sld [smem:[#allocation30_spill]] }
  0x89   : > { %v919_v21 = vsub.f32 1.0, %v918_v20 }
  0x8b   : > { %v920_v22 = vmul.f32 %v2463_v19, %v919_v21 }
  0x8d   : > { %v921_v23 = vadd.f32 %v2463_v19, %v920_v22 }
  0x8e   : > { %915 = vadd.xlane.f32.xlu0 %v914_v17 }
  0x8f   : > { %v3065_v24 = vsel %vm922_vm3, %v2463_v19, %v921_v23 }
  0xf9   : > { %v913_v25 = vpop.xlane.xlu0 %912 }
  0xfa   : > { %v924_v26 = vmul.f32 %v3065_v24, %v913_v25 }
  0xfc   : > { %v926_v27 = vsub.f32 %v906_v14, %v924_v26 }
  0xfe   : > { %v928_v28 = vmul.f32 %v926_v27, %v926_v27 }
 0x100   : > { %v930_v29 = vsel %vm910_vm2, %v928_v28, 0.0 }
 0x101   : > { %931 = vadd.xlane.f32.xlu1 %v930_v29  ;;  %v916_v30 = vpop.xlane.xlu0 %915 }
 0x102   : > { %v925_v31 = vmul.f32 %v3065_v24, %v916_v30 }
 0x104   : > { %v927_v32 = vsub.f32 %v907_v16, %v925_v31 }
 0x106   : > { %v929_v33 = vmul.f32 %v927_v32, %v927_v32 }
 0x108   : > { %v933_v34 = vsel %vm910_vm2, %v929_v33, 0.0 }
 0x109   : > { %934 = vadd.xlane.f32.xlu1 %v933_v34 }
 0x174   : > { %v932_v36 = vpop.xlane.xlu1 %931 }
 0x175   : > { %v936_v38 = vmul.f32 %v932_v36, %v3065_v24  ;;  %v1012_v36 = vld [vmem:[#allocation6] sm:$0xff] }
 0x177   : > { %v938_v39 = vadd.f32 1e-05, %v936_v38 }
 0x179   : > { %2464 = vrsqrt.f32 %v938_v39  ;;  %vm946_vm5 = vweird.f32 %v938_v39 }
 0x17c   : > { %v935_v40 = vpop.xlane.xlu1 %934 }
 0x17d   : > { %v937_v41 = vmul.f32 %v935_v40, %v3065_v24 }
 0x17f   : > { %v2465_v42 = vpop.eup %2464  ;;  %v939_v43 = vadd.f32 1e-05, %v937_v41 }
 0x180   : > { %v941_v44 = vmul.f32 %v2465_v42, %v938_v39  ;;  %vm947_vm4 = vweird.f32 %v2465_v42 }
 0x181   : > { %2466 = vrsqrt.f32 %v939_v43  ;;  %vm948_vm6 = vmor %vm946_vm5, %vm947_vm4  ;;  %vm956_vm8 = vweird.f32 %v939_v43 }
 0x182   : > { %v942_v45 = vmul.f32 %v2465_v42, %v941_v44 }
 0x184   : > { %v943_v46 = vmul.f32 0.5, %v942_v45 }
 0x186   : > { %v944_v47 = vsub.f32 1.5, %v943_v46 }
 0x187   : > { %v2467_v48 = vpop.eup %2466 }
 0x188   : > { %v945_v49 = vmul.f32 %v2465_v42, %v944_v47  ;;  %v951_v50 = vmul.f32 %v2467_v48, %v939_v43  ;;  %vm957_vm7 = vweird.f32 %v2467_v48 }
 0x189   : > { %vm958_vm9 = vmor %vm956_vm8, %vm957_vm7 }
 0x18a   : > { %v952_v51 = vmul.f32 %v2467_v48, %v951_v50  ;;  %v949_v52 = vsel %vm948_vm6, %v2465_v42, %v945_v49 }
 0x18b   : > { %v960_v55 = vmul.f32 %v949_v52, %v926_v27 }
 0x18c   : > { %v953_v53 = vmul.f32 0.5, %v952_v51 }
 0x18d   : > { %v965_v60 = vmul.f32 %v2458_v56, %v960_v55 }
 0x18e   : > { %v954_v54 = vsub.f32 1.5, %v953_v53 }
 0x18f   : > { %v970_v63 = vadd.f32 %v2459_v61, %v965_v60 }
 0x190   : > { %v955_v57 = vmul.f32 %v2467_v48, %v954_v54 }
 0x192   : > { %v959_v58 = vsel %vm958_vm9, %v2467_v48, %v955_v57 }
 0x193   : > { %v961_v59 = vmul.f32 %v959_v58, %v927_v32 }
 0x195   : > { %v966_v62 = vmul.f32 %v2458_v56, %v961_v59 }
 0x197   : > { %v971_v0 = vadd.f32 %v2459_v61, %v966_v62 }
 0x199   : > { %v972_v1 = vpack.c.bf16 %v971_v0, %v970_v63 }
 0x19b   : > { %2216 = vmatmul.msk.bf16.vlgmr.msra.gmra.mxu0 %vm910_vm2, %v972_v1 }
 0x218   : > { %v1005_v3 = vpop.f32.mrf.mxu0 }
 0x219   : > { %v1006_v4 = vadd.f32 %v2460_v2, %v1005_v3 }
 0x21b   : > { %v1010_v5 = vpack.c.bf16 %v1006_v4, %v1006_v4 }
 0x21d   : > { %v1014_v6 = vunpack.c.l.b16 %v1010_v5 }
 0x21f   : > { %v3091_v7 = vpack.c.b16 %v1014_v6, %v1014_v6 }
 0x220   : > { %v1007_v8 = vpop.f32.mrf.mxu0 }
 0x221   : > { %v1008_v9 = vadd.f32 %v2460_v2, %v1007_v8  ;;  %1159 = vrot.lane.b32.xlu0 %v3091_v7, %s2725_s25  ;;  %1016 = vrot.lane.b32.xlu2 %v3091_v7, %s2726_s29 }
 0x223   : > { %v1011_v10 = vpack.c.bf16 %v1008_v9, %v1008_v9 }
 0x225   : > { %v1039_v11 = vunpack.c.l.b16 %v1011_v10 }
 0x227   : > { %v3095_v12 = vpack.c.b16 %v1039_v11, %v1039_v11 }
 0x229   : > { %1182 = vrot.lane.b32.xlu1 %v3095_v12, %s2725_s25  ;;  %1322 = vrot.lane.b32.xlu0 %v3095_v12, %s2727_s1 }
 0x22a   : > { %1041 = vrot.lane.b32.xlu2 %v3095_v12, %s2726_s29 }
 0x231   : > { %1320 = vrot.lane.b32.xlu1 %v3095_v12, %s2728_s23  ;;  %1439 = vrot.lane.b32.xlu0 %v3091_v7, %s2729_s18 }
 0x232   : > { %1157 = vrot.lane.b32.xlu2 %v3091_v7, %s2730_s12 }
 0x239   : > { %1437 = vrot.lane.b32.xlu1 %v3091_v7, %s2731_s28  ;;  %1460 = vrot.lane.b32.xlu0 %v3095_v12, %s2731_s28 }
 0x23a   : > { %1180 = vrot.lane.b32.xlu2 %v3095_v12, %s2730_s12  ;;  %s3542_s12 = sld [smem:[#allocation40_spill]] }
 0x240   : > { %s3543_s28 = scalar_lea.vmem %s3542_s12, %s3000_s19 }
 0x242   : > { %1299 = vrot.lane.b32.xlu2 %v3091_v7, %s2727_s1 }
 0x24a   : > { %1297 = vrot.lane.b32.xlu2 %v3091_v7, %s2728_s23 }
 0x252   : > { %1462 = vrot.lane.b32.xlu2 %v3095_v12, %s2729_s18 }
 0x27b   : > { %v1017_v13 = vpop.permute.xlu2 %1016 }
 0x27c   : > { %v1023_v14 = vsel %vm1018_vm10, %v1017_v13, 0 }
 0x27d   : > { %1032 = vmatpush.bf16.xpose.msra.mxu1 %v1023_v14 }
 0x284   : > { %v1042_v15 = vpop.permute.xlu2 %1041  ;;  %2217 = vmatmul.msk.bf16.vlgmr.msra.gmra.mxu1 %vm1018_vm10, %v1010_v5 }
 0x285   : > { %v1047_v16 = vsel %vm1018_vm10, %v1042_v15, 0 }
 0x286   : > { %1056 = vmatpush.bf16.xpose.msra.mxu2 %v1047_v16 }
 0x28c   : > { %v1158_v17 = vpop.permute.xlu2 %1157 }
 0x28d   : > { %2218 = vmatmul.msk.bf16.vlgmr.msra.gmra.mxu2 %vm1018_vm10, %v1011_v10 }
 0x293   : > { %v1160_v18 = vpop.permute.xlu0 %1159 }
 0x294   : > { %v1181_v19 = vpop.permute.xlu2 %1180  ;;  %v1165_v20 = vsel %vm1018_vm10, %v1160_v18, 0 }
 0x295   : > { %1174 = vmatpush.bf16.xpose.msrb.mxu0 %v1165_v20 }
 0x29b   : > { %v1183_v21 = vpop.permute.xlu1 %1182  ;;  %v1323_v22 = vpop.permute.xlu0 %1322 }
 0x29c   : > { %v1328_v23 = vsel %vm1018_vm10, %v1323_v22, 0  ;;  %v1300_v25 = vpop.permute.xlu2 %1299  ;;  %2221 = vmatmul.msk.bf16.vlgmr.msrb.gmra.mxu0 %vm1018_vm10, %v1158_v17  ;;  %v1188_v26 = vsel %vm1018_vm10, %v1183_v21, 0 }
 0x29d   : > { %v1305_v27 = vsel %vm1018_vm10, %v1300_v25, 0  ;;  %1197 = vmatpush.bf16.xpose.msrb.mxu1 %v1188_v26 }
 0x29e   : > { %1314 = vmatpush.bf16.xpose.msra.mxu0 %v1305_v27 }
 0x2a3   : > { %v1440_v28 = vpop.permute.xlu0 %1439  ;;  %v1321_v33 = vpop.permute.xlu1 %1320 }
 0x2a4   : > { %v1445_v29 = vsel %vm1018_vm10, %v1440_v28, 0  ;;  %v1298_v30 = vpop.permute.xlu2 %1297  ;;  %2222 = vmatmul.msk.bf16.vlgmr.msrb.gmra.mxu1 %vm1018_vm10, %v1181_v19 }
 0x2a5   : > { %1337 = vmatpush.bf16.xpose.msra.mxu1 %v1328_v23 }
 0x2a6   : > { %1454 = vmatpush.bf16.xpose.msrb.mxu0 %v1445_v29 }
 0x2ab   : > { %v1438_v34 = vpop.permute.xlu1 %1437  ;;  %v1461_v35 = vpop.permute.xlu0 %1460 }
 0x2ac   : > { %v1463_v31 = vpop.permute.xlu2 %1462  ;;  %2225 = vmatmul.msk.bf16.vlgmr.msra.gmra.mxu0 %vm1018_vm10, %v1298_v30 }
 0x2ad   : > { %v1468_v32 = vsel %vm1018_vm10, %v1463_v31, 0 }
 0x2ae   : > { %1477 = vmatpush.bf16.xpose.msrb.mxu1 %v1468_v32 }
 0x2b4   : > { %2226 = vmatmul.msk.bf16.vlgmr.msra.gmra.mxu1 %vm1018_vm10, %v1321_v33 }
 0x2bc   : > { %2229 = vmatmul.msk.bf16.vlgmr.msrb.gmra.mxu0 %vm1018_vm10, %v1438_v34 }
 0x2c4   : > { %2230 = vmatmul.msk.bf16.vlgmr.msrb.gmra.mxu1 %vm1018_vm10, %v1461_v35 }
 0x301   : > { %v1034_v37 = vpop.f32.mrf.mxu1 }
 0x302   : > { %v1035_v38 = vadd.f32 %v1034_v37, %v1012_v36 }
 0x304   : > { %v1062_v39 = vsel %vm1018_vm10, %v1035_v38, -inf }
 0x305   : > { %1063 = vmax.xlane.f32.xlu2 %v1062_v39 }
 0x309   : > { %v1036_v40 = vpop.f32.mrf.mxu1 }
 0x310   : > { %v1058_v41 = vpop.f32.mrf.mxu2 }
 0x311   : > { %v1059_v42 = vadd.f32 %v1058_v41, %v1012_v36 }
 0x313   : > { %v1065_v43 = vsel %vm1018_vm10, %v1059_v42, -inf }
 0x314   : > { %1066 = vmax.xlane.f32.xlu1 %v1065_v43 }
 0x318   : > { %v1060_v44 = vpop.f32.mrf.mxu2 }
 0x319   : > { %v1176_v45 = vpop.f32.mrf.mxu0 }
 0x31a   : > { %v1177_v46 = vadd.f32 %v1176_v45, %v1012_v36 }
 0x31c   : > { %v1203_v47 = vsel %vm1018_vm10, %v1177_v46, -inf }
 0x31d   : > { %1204 = vmax.xlane.f32.xlu0 %v1203_v47 }
 0x321   : > { %v1178_v48 = vpop.f32.mrf.mxu0  ;;  %v1199_v49 = vpop.f32.mrf.mxu1 }
 0x322   : > { %v1200_v50 = vadd.f32 %v1199_v49, %v1012_v36 }
 0x324   : > { %v1206_v51 = vsel %vm1018_vm10, %v1200_v50, -inf }
 0x325   : > { %1207 = vmax.xlane.f32.xlu2 %v1206_v51 }
 0x329   : > { %v1201_v52 = vpop.f32.mrf.mxu1  ;;  %v1316_v53 = vpop.f32.mrf.mxu0 }
 0x32a   : > { %v1317_v1 = vadd.f32 %v1316_v53, %v1012_v36 }
 0x32c   : > { %v1343_v2 = vsel %vm1018_vm10, %v1317_v1, -inf }
 0x32d   : > { %1112 = vrot.lane.b32.xlu1 %v3091_v7, %s2732_s7 }
 0x331   : > { %v1318_v54 = vpop.f32.mrf.mxu0  ;;  %v1339_v55 = vpop.f32.mrf.mxu1 }
 0x332   : > { %v3130_v56 = vadd.f32 %v1339_v55, %v1012_v36 }
 0x334   : > { %v1346_v57 = vsel %vm1018_vm10, %v3130_v56, -inf }
 0x335   : > { %1347 = vmax.xlane.f32.xlu0 %v1346_v57 }
 0x339   : > { %v1341_v58 = vpop.f32.mrf.mxu1  ;;  %v1456_v59 = vpop.f32.mrf.mxu0 }
 0x33a   : > { %v1457_v3 = vadd.f32 %v1456_v59, %v1012_v36 }
 0x33c   : > { %v1483_v4 = vsel %vm1018_vm10, %v1457_v3, -inf }
 0x33d   : > { %1274 = vrot.lane.b32.xlu2 %v3095_v12, %s2733_s4 }
 0x341   : > { %v1458_v60 = vpop.f32.mrf.mxu0  ;;  %v1479_v61 = vpop.f32.mrf.mxu1 }
 0x342   : > { %v1480_v62 = vadd.f32 %v1479_v61, %v1012_v36 }
 0x344   : > { %v1486_v63 = vsel %vm1018_vm10, %v1480_v62, -inf }
 0x345   : > { %1487 = vmax.xlane.f32.xlu0 %v1486_v63 }
 0x349   : > { %v1481_v0 = vpop.f32.mrf.mxu1 }
 0x357   : > { %1344 = vmax.xlane.f32.xlu1 %v1343_v2 }
 0x359   : > { %1134 = vrot.lane.b32.xlu0 %v3095_v12, %s2732_s7 }
 0x35f   : > { %1484 = vmax.xlane.f32.xlu1 %v1483_v4 }
 0x378   : > { %1253 = vrot.lane.b32.xlu1 %v3091_v7, %s2733_s4  ;;  %v1064_v5 = vpop.xlane.xlu2 %1063 }
 0x379   : > { %v1068_v6 = vsub.f32 %v1035_v38, %v1064_v5 }
 0x37b   : > { %v1070_v8 = vmul.f32 1.442695, %v1068_v6 }
 0x37d   : > { %2468 = vpow2.f32 %v1070_v8 }
 0x383   : > { %v3140_v9 = vpop.eup %2468 }
 0x384   : > { %v1074_v10 = vsel %vm1018_vm10, %v3140_v9, 0.0 }
 0x385   : > { %1075 = vadd.xlane.f32.xlu2 %v1074_v10 }
 0x387   : > { %v1067_v11 = vpop.xlane.xlu1 %1066 }
 0x388   : > { %v1069_v13 = vsub.f32 %v1059_v42, %v1067_v11 }
 0x38a   : > { %v1072_v14 = vmul.f32 1.442695, %v1069_v13 }
 0x38c   : > { %2470 = vpow2.f32 %v1072_v14 }
 0x390   : > { %v1205_v15 = vpop.xlane.xlu0 %1204 }
 0x391   : > { %v1209_v16 = vsub.f32 %v1177_v46, %v1205_v15 }
 0x392   : > { %v3144_v17 = vpop.eup %2470 }
 0x393   : > { %v1211_v18 = vmul.f32 1.442695, %v1209_v16  ;;  %v1077_v19 = vsel %vm1018_vm10, %v3144_v17, 0.0 }
 0x394   : > { %1078 = vadd.xlane.f32.xlu2 %v1077_v19 }
 0x395   : > { %2472 = vpow2.f32 %v1211_v18 }
 0x398   : > { %v1208_v20 = vpop.xlane.xlu2 %1207 }
 0x399   : > { %v1210_v21 = vsub.f32 %v1200_v50, %v1208_v20 }
 0x39b   : > { %v3148_v22 = vpop.eup %2472  ;;  %v1213_v23 = vmul.f32 1.442695, %v1210_v21 }
 0x39c   : > { %v1215_v25 = vsel %vm1018_vm10, %v3148_v22, 0.0 }
 0x39d   : > { %2474 = vpow2.f32 %v1213_v23  ;;  %1216 = vadd.xlane.f32.xlu0 %v1215_v25 }
 0x39f   : > { %v1113_v26 = vpop.permute.xlu1 %1112 }
 0x3a0   : > { %v1119_v27 = vsel %vm1117_vm11, %v1113_v26, 0  ;;  %v1275_v54 = vpop.permute.xlu2 %1274 }
 0x3a1   : > { %1128 = vmatpush.bf16.msra.mxu3 %v1119_v27  ;;  %v1280_v5 = vsel %vm1117_vm11, %v1275_v54, 0 }
 0x3a3   : > { %v3153_v28 = vpop.eup %2474 }
 0x3a4   : > { %v1218_v29 = vsel %vm1018_vm10, %v3153_v28, 0.0 }
 0x3a5   : > { %1219 = vadd.xlane.f32.xlu2 %v1218_v29 }
 0x3a8   : > { %v1348_v30 = vpop.xlane.xlu0 %1347 }
 0x3a9   : > { %v1350_v40 = vsub.f32 %v3130_v56, %v1348_v30 }
 0x3ab   : > { %v1353_v42 = vmul.f32 1.442695, %v1350_v40 }
 0x3b8   : > { %v1488_v31 = vpop.xlane.xlu0 %1487 }
 0x3b9   : > { %v1490_v32 = vsub.f32 %v1480_v62, %v1488_v31 }
 0x3bb   : > { %v1493_v33 = vmul.f32 1.442695, %v1490_v32 }
 0x3bd   : > { %2476 = vpow2.f32 %v1493_v33 }
 0x3c3   : > { %v3157_v34 = vpop.eup %2476 }
 0x3c4   : > { %v1498_v35 = vsel %vm1018_vm10, %v3157_v34, 0.0 }
 0x3c5   : > { %1499 = vadd.xlane.f32.xlu1 %v1498_v35 }
 0x3ca   : > { %v1345_v36 = vpop.xlane.xlu1 %1344 }
 0x3cb   : > { %v1349_v37 = vsub.f32 %v1317_v1, %v1345_v36  ;;  %v1135_v38 = vpop.permute.xlu0 %1134 }
 0x3cc   : > { %v1140_v39 = vsel %vm1117_vm11, %v1135_v38, 0 }
 0x3cd   : > { %v1351_v41 = vmul.f32 1.442695, %v1349_v37  ;;  %1149 = vmatpush.bf16.msrb.mxu3 %v1140_v39 }
 0x3cf   : > { %2478 = vpow2.f32 %v1351_v41 }
 0x3d0   : > { %2480 = vpow2.f32 %v1353_v42 }
 0x3d2   : > { %v1485_v43 = vpop.xlane.xlu1 %1484 }
 0x3d3   : > { %v1489_v44 = vsub.f32 %v1457_v3, %v1485_v43 }
 0x3d5   : > { %v3163_v45 = vpop.eup %2478  ;;  %v1491_v46 = vmul.f32 1.442695, %v1489_v44 }
 0x3d6   : > { %v1355_v47 = vsel %vm1018_vm10, %v3163_v45, 0.0  ;;  %v3167_v48 = vpop.eup %2480 }
 0x3d7   : > { %2482 = vpow2.f32 %v1491_v46  ;;  %1356 = vadd.xlane.f32.xlu2 %v1355_v47  ;;  %v1358_v51 = vsel %vm1018_vm10, %v3167_v48, 0.0 }
 0x3dd   : > { %v3169_v49 = vpop.eup %2482 }
 0x3de   : > { %v1495_v50 = vsel %vm1018_vm10, %v3169_v49, 0.0 }
 0x3df   : > { %1496 = vadd.xlane.f32.xlu0 %v1495_v50  ;;  %1359 = vadd.xlane.f32.xlu2 %v1358_v51 }
 0x3ea   : > { %v1254_v52 = vpop.permute.xlu1 %1253 }
 0x3eb   : > { %v1259_v53 = vsel %vm1117_vm11, %v1254_v52, 0 }
 0x3ec   : > { %1268 = vmatpush.bf16.msrb.mxu2 %v1259_v53 }
 0x3f3   : > { %1554 = vrot.lane.b32.xlu0 %v3095_v12, %s2734_s3 }
 0x3f7   : > { %1393 = vrot.lane.b32.xlu2 %v3091_v7, %s2735_s2 }
 0x3f8   : > { %v1076_v55 = vpop.xlane.xlu2 %1075 }
 0x3f9   : > { %2484 = vrcp.f32 %v1076_v55  ;;  %v1091_v60 = vand.u32 2147483648, %v1076_v55  ;;  %v1089_v61 = vand.u32 2147483647, %v1076_v55  ;;  %vm1085_vm13 = vweird.f32 %v1076_v55 }
 0x3fb   : > { %v1092_v0 = vor.u32 1.1754944e-38, %v1091_v60  ;;  %vm1090_vm15 = vcmp.eq.f32.partialorder %v1089_v61, 8.507059e+37 }
 0x3ff   : > { %v2485_v56 = vpop.eup %2484  ;;  %1414 = vrot.lane.b32.xlu2 %v3095_v12, %s2735_s2 }
 0x400   : > { %v1081_v57 = vmul.f32 %v2485_v56, %v1076_v55  ;;  %vm1086_vm12 = vweird.f32 %v2485_v56 }
 0x401   : > { %vm1087_vm14 = vmor %vm1085_vm13, %vm1086_vm12 }
 0x402   : > { %v1082_v58 = vsub.f32 1.0, %v1081_v57 }
 0x404   : > { %v1083_v59 = vmul.f32 %v2485_v56, %v1082_v58 }
 0x406   : > { %v1084_v62 = vadd.f32 %v2485_v56, %v1083_v59 }
 0x407   : > { %1533 = vrot.lane.b32.xlu2 %v3091_v7, %s2734_s3  ;;  %v1079_v63 = vpop.xlane.xlu2 %1078 }
 0x408   : > { %2486 = vrcp.f32 %v1079_v63  ;;  %v1088_v1 = vsel %vm1087_vm14, %v2485_v56, %v1084_v62  ;;  %v1106_v7 = vand.u32 2147483648, %v1079_v63  ;;  %v1104_v13 = vand.u32 2147483647, %v1079_v63 }
 0x409   : > { %v1093_v2 = vsel %vm1090_vm15, %v1092_v0, %v1088_v1  ;;  %vm1100_vm1 = vweird.f32 %v1079_v63 }
 0x40a   : > { %v1094_v3 = vmul.f32 %v3140_v9, %v1093_v2  ;;  %v1107_v15 = vor.u32 1.1754944e-38, %v1106_v7  ;;  %vm1105_vm4 = vcmp.eq.f32.partialorder %v1104_v13, 8.507059e+37 }
 0x40c   : > { %v1110_v12 = vpack.c.bf16 %v1094_v3, %v1094_v3 }
 0x40e   : > { %v2487_v4 = vpop.eup %2486  ;;  %2219 = vmatmul.msk.bf16.vlgmr.msra.gmra.mxu3 %vm1018_vm10, %v1110_v12 }
 0x40f   : > { %v1096_v6 = vmul.f32 %v2487_v4, %v1079_v63  ;;  %1289 = vmatpush.bf16.msra.mxu3 %v1280_v5  ;;  %vm1101_vm0 = vweird.f32 %v2487_v4 }
 0x410   : > { %v1217_v8 = vpop.xlane.xlu0 %1216  ;;  %vm1102_vm3 = vmor %vm1100_vm1, %vm1101_vm0 }
 0x411   : > { %v1097_v10 = vsub.f32 1.0, %v1096_v6  ;;  %2488 = vrcp.f32 %v1217_v8  ;;  %v1232_v25 = vand.u32 2147483648, %v1217_v8  ;;  %v1230_v27 = vand.u32 2147483647, %v1217_v8 }
 0x412   : > { %vm1226_vm6 = vweird.f32 %v1217_v8 }
 0x413   : > { %v1098_v11 = vmul.f32 %v2487_v4, %v1097_v10  ;;  %v1233_v32 = vor.u32 1.1754944e-38, %v1232_v25  ;;  %vm1231_vm8 = vcmp.eq.f32.partialorder %v1230_v27, 8.507059e+37 }
 0x415   : > { %v1099_v14 = vadd.f32 %v2487_v4, %v1098_v11 }
 0x417   : > { %v2489_v9 = vpop.eup %2488  ;;  %v1103_v16 = vsel %vm1102_vm3, %v2487_v4, %v1099_v14 }
 0x418   : > { %v1222_v18 = vmul.f32 %v2489_v9, %v1217_v8  ;;  %v1220_v19 = vpop.xlane.xlu2 %1219  ;;  %v1108_v20 = vsel %vm1105_vm4, %v1107_v15, %v1103_v16  ;;  %vm1227_vm5 = vweird.f32 %v2489_v9 }
 0x419   : > { %2490 = vrcp.f32 %v1220_v19  ;;  %v1109_v23 = vmul.f32 %v3144_v17, %v1108_v20  ;;  %vm1228_vm7 = vmor %vm1226_vm6, %vm1227_vm5  ;;  %v1247_v17 = vand.u32 2147483648, %v1220_v19  ;;  %v1245_v40 = vand.u32 2147483647, %v1220_v19 }
 0x41a   : > { %v1223_v21 = vsub.f32 1.0, %v1222_v18  ;;  %vm1241_vm12 = vweird.f32 %v1220_v19 }
 0x41b   : > { %v1111_v29 = vpack.c.bf16 %v1109_v23, %v1109_v23  ;;  %v1248_v43 = vor.u32 1.1754944e-38, %v1247_v17  ;;  %vm1246_vm14 = vcmp.eq.f32.partialorder %v1245_v40, 8.507059e+37 }
 0x41c   : > { %v1224_v26 = vmul.f32 %v2489_v9, %v1223_v21 }
 0x41e   : > { %v1225_v30 = vadd.f32 %v2489_v9, %v1224_v26  ;;  %2220 = vmatmul.msk.bf16.vlgmr.msrb.gmra.mxu3 %vm1018_vm10, %v1111_v29 }
 0x41f   : > { %v2491_v31 = vpop.eup %2490 }
 0x420   : > { %v1237_v33 = vmul.f32 %v2491_v31, %v1220_v19  ;;  %v1229_v35 = vsel %vm1228_vm7, %v2489_v9, %v1225_v30  ;;  %vm1242_vm9 = vweird.f32 %v2491_v31 }
 0x421   : > { %v1234_v36 = vsel %vm1231_vm8, %v1233_v32, %v1229_v35  ;;  %vm1243_vm13 = vmor %vm1241_vm12, %vm1242_vm9 }
 0x422   : > { %v1238_v37 = vsub.f32 1.0, %v1237_v33  ;;  %v1235_v38 = vmul.f32 %v3148_v22, %v1234_v36 }
 0x424   : > { %v1239_v39 = vmul.f32 %v2491_v31, %v1238_v37  ;;  %v1251_v41 = vpack.c.bf16 %v1235_v38, %v1235_v38 }
 0x426   : > { %v1240_v42 = vadd.f32 %v2491_v31, %v1239_v39  ;;  %2223 = vmatmul.msk.bf16.vlgmr.msrb.gmra.mxu2 %vm1018_vm10, %v1251_v41 }
 0x428   : > { %v1244_v44 = vsel %vm1243_vm13, %v2491_v31, %v1240_v42 }
 0x429   : > { %v1249_v46 = vsel %vm1246_vm14, %v1248_v43, %v1244_v44 }
 0x42a   : > { %v1250_v47 = vmul.f32 %v3153_v28, %v1249_v46 }
 0x42c   : > { %v1252_v50 = vpack.c.bf16 %v1250_v47, %v1250_v47 }
 0x42e   : > { %2224 = vmatmul.msk.bf16.vlgmr.msra.gmra.mxu3 %vm1018_vm10, %v1252_v50 }
 0x438   : > { %v3189_v51 = vpop.xlane.xlu1 %1499 }
 0x439   : > { %v1527_v38 = vand.u32 2147483648, %v3189_v51 }
 0x43b   : > { %v1528_v42 = vor.u32 1.1754944e-38, %v1527_v38 }
 0x44a   : > { %v1357_v22 = vpop.xlane.xlu2 %1356 }
 0x44b   : > { %2492 = vrcp.f32 %v1357_v22  ;;  %v1372_v57 = vand.u32 2147483648, %v1357_v22  ;;  %v1370_v28 = vand.u32 2147483647, %v1357_v22  ;;  %vm1366_vm0 = vweird.f32 %v1357_v22 }
 0x44c   : > { %2494 = vrcp.f32 %v3189_v51 }
 0x44d   : > { %v1373_v62 = vor.u32 1.1754944e-38, %v1372_v57  ;;  %vm1371_vm3 = vcmp.eq.f32.partialorder %v1370_v28, 8.507059e+37 }
 0x451   : > { %v2493_v52 = vpop.eup %2492 }
 0x452   : > { %v1362_v53 = vmul.f32 %v2493_v52, %v1357_v22  ;;  %v1497_v54 = vpop.xlane.xlu0 %1496  ;;  %v1360_v55 = vpop.xlane.xlu2 %1359  ;;  %vm1367_vm15 = vweird.f32 %v2493_v52 }
 0x453   : > { %2496 = vrcp.f32 %v1497_v54  ;;  %v3192_v59 = vpop.eup %2494  ;;  %vm1368_vm1 = vmor %vm1366_vm0, %vm1367_vm15  ;;  %v1387_v11 = vand.u32 2147483648, %v1360_v55  ;;  %v1385_v15 = vand.u32 2147483647, %v1360_v55  ;;  %v1512_v18 = vand.u32 2147483648, %v1497_v54 }
 0x454   : > { %v1363_v56 = vsub.f32 1.0, %v1362_v53  ;;  %2498 = vrcp.f32 %v1360_v55  ;;  %v1517_v8 = vmul.f32 %v3192_v59, %v3189_v51  ;;  %vm1381_vm6 = vweird.f32 %v1360_v55 }
 0x455   : > { %vm1506_vm7 = vweird.f32 %v1497_v54  ;;  %v1388_v20 = vor.u32 1.1754944e-38, %v1387_v11  ;;  %vm1386_vm12 = vcmp.eq.f32.partialorder %v1385_v15, 8.507059e+37  ;;  %v1513_v30 = vor.u32 1.1754944e-38, %v1512_v18  ;;  %v2307_v18 = vld [vmem:[%s3537_s16] sm:$0xff] }
 0x456   : > { %v1364_v58 = vmul.f32 %v2493_v52, %v1363_v56  ;;  %v1518_v16 = vsub.f32 1.0, %v1517_v8  ;;  %vm1522_vm14 = vweird.f32 %v3192_v59  ;;  %vm1521_vm15 = vweird.f32 %v3189_v51 }
 0x457   : > { %vm1523_vm0 = vmor %vm1521_vm15, %vm1522_vm14 }
 0x458   : > { %v1365_v60 = vadd.f32 %v2493_v52, %v1364_v58  ;;  %v1519_v29 = vmul.f32 %v3192_v59, %v1518_v16  ;;  %v2308_v16 = vld [vmem:[%s3537_s16 + $0x8] sm:$0xff] }
 0x459   : > { %v2497_v61 = vpop.eup %2496  ;;  %1657 = vmatpush.bf16.msra.mxu0 %v2308_v16 }
 0x45a   : > { %v2499_v63 = vpop.eup %2498  ;;  %v1369_v0 = vsel %vm1368_vm1, %v2493_v52, %v1365_v60  ;;  %v1502_v1 = vmul.f32 %v2497_v61, %v1497_v54  ;;  %v1394_v2 = vpop.permute.xlu2 %1393  ;;  %vm1507_vm5 = vweird.f32 %v2497_v61  ;;  %v1520_v37 = vadd.f32 %v3192_v59, %v1519_v29 }
 0x45b   : > { %v1374_v3 = vsel %vm1371_vm3, %v1373_v62, %v1369_v0  ;;  %v1377_v12 = vmul.f32 %v2499_v63, %v1360_v55  ;;  %v1399_v4 = vsel %vm1117_vm11, %v1394_v2, 0  ;;  %vm1382_vm4 = vweird.f32 %v2499_v63  ;;  %vm1508_vm9 = vmor %vm1506_vm7, %vm1507_vm5 }
 0x45c   : > { %v1375_v5 = vmul.f32 %v3163_v45, %v1374_v3  ;;  %v1503_v6 = vsub.f32 1.0, %v1502_v1  ;;  %1408 = vmatpush.bf16.msra.mxu2 %v1399_v4  ;;  %v1510_v45 = vand.u32 2147483647, %v1497_v54  ;;  %vm1383_vm8 = vmor %vm1381_vm6, %vm1382_vm4  ;;  %v1524_v41 = vsel %vm1523_vm0, %v3192_v59, %v1520_v37 }
 0x45d   : > { %v1378_v10 = vsub.f32 1.0, %v1377_v12  ;;  %1658 = vmatpush.bf16.msra.mxu0 %v2307_v18  ;;  %vm1618_vm3 = vcmask 195584  }
 0x45e   : > { %v1504_v7 = vmul.f32 %v2497_v61, %v1503_v6  ;;  %v1391_v13 = vpack.c.bf16 %v1375_v5, %v1375_v5  ;;  %vm1511_vm13 = vcmp.eq.f32.partialorder %v1510_v45, 8.507059e+37 }
 0x45f   : > { %v1379_v14 = vmul.f32 %v2499_v63, %v1378_v10 }
 0x460   : > { %v1505_v9 = vadd.f32 %v2497_v61, %v1504_v7  ;;  %2227 = vmatmul.msk.bf16.vlgmr.msra.gmra.mxu2 %vm1018_vm10, %v1391_v13 }
 0x461   : > { %v1380_v19 = vadd.f32 %v2499_v63, %v1379_v14 }
 0x462   : > { %v1415_v21 = vpop.permute.xlu2 %1414  ;;  %v1509_v26 = vsel %vm1508_vm9, %v2497_v61, %v1505_v9 }
 0x463   : > { %v1384_v23 = vsel %vm1383_vm8, %v2499_v63, %v1380_v19  ;;  %v1420_v25 = vsel %vm1117_vm11, %v1415_v21, 0  ;;  %v1514_v35 = vsel %vm1511_vm13, %v1513_v30, %v1509_v26 }
 0x464   : > { %v1389_v27 = vsel %vm1386_vm12, %v1388_v20, %v1384_v23  ;;  %1429 = vmatpush.bf16.msrb.mxu3 %v1420_v25  ;;  %v1515_v17 = vmul.f32 %v3169_v49, %v1514_v35 }
 0x465   : > { %v1390_v31 = vmul.f32 %v3167_v48, %v1389_v27  ;;  %v1555_v32 = vpop.permute.xlu0 %1554  ;;  %v1525_v48 = vand.u32 2147483647, %v3189_v51 }
 0x466   : > { %v1560_v33 = vsel %vm1117_vm11, %v1555_v32, 0  ;;  %v1531_v43 = vpack.c.bf16 %v1515_v17, %v1515_v17  ;;  %v3225_v17 = vld [vmem:[%s858_s21] sm:$0x1] }
 0x467   : > { %v1392_v36 = vpack.c.bf16 %v1390_v31, %v1390_v31  ;;  %vm1526_vm1 = vcmp.eq.f32.partialorder %v1525_v48, 8.507059e+37  ;;  %v3231_v48 = vld [vmem:[%s3042_s26] sm:$0xf] }
 0x468   : > { %1569 = vmatpush.bf16.msra.mxu3 %v1560_v33  ;;  %v1529_v44 = vsel %vm1526_vm1, %v1528_v42, %v1524_v41  ;;  %v3237_v41 = vld [vmem:[%s3042_s26 + $0x8] sm:$0xf]  ;;  %v3240_v42 = vld [vmem:[%s3042_s26 + $0x8] sm:$0xf0] }
 0x469   : > { %2228 = vmatmul.msk.bf16.vlgmr.msrb.gmra.mxu3 %vm1018_vm10, %v1392_v36  ;;  %v1530_v46 = vmul.f32 %v3157_v34, %v1529_v44  ;;  %v3250_v44 = vld [vmem:[%s3056_s30] sm:$0xf] }
 0x46a   : > { %v1534_v39 = vpop.permute.xlu2 %1533 }
 0x46b   : > { %v1539_v40 = vsel %vm1117_vm11, %v1534_v39, 0  ;;  %v1532_v49 = vpack.c.bf16 %v1530_v46, %v1530_v46  ;;  %vm1613_vm11 = vcmask 130048   ;;  %v3228_v39 = vld [vmem:[%s3538_s0] sm:$0x1]  ;;  %v3253_v46 = vld [vmem:[%s3056_s30] sm:$0xf0] }
 0x46c   : > { %1548 = vmatpush.bf16.msrb.mxu2 %v1539_v40  ;;  %v3234_v40 = vld [vmem:[%s3042_s26] sm:$0xf0] }
 0x470   : > { %2231 = vmatmul.msk.bf16.vlgmr.msrb.gmra.mxu2 %vm1018_vm10, %v1531_v43  ;;  %v3247_v43 = vld [vmem:[%s866_s9] sm:$0x1] }
 0x479   : > { %2232 = vmatmul.msk.bf16.vlgmr.msra.gmra.mxu3 %vm1018_vm10, %v1532_v49  ;;  %v3256_v49 = vld [vmem:[%s3056_s30 + $0x8] sm:$0xf] }
 0x491   : > { %v1130_v47 = vpop.f32.mrf.mxu3 }
 0x492   : > { %v1155_v21 = vpack.c.bf16 %v1130_v47, %v1130_v47  ;;  %v3259_v47 = vld [vmem:[%s3056_s30 + $0x8] sm:$0xf0] }
 0x499   : > { %v1132_v50 = vpop.f32.mrf.mxu3 }
 0x49a   : > { %v3262_v50 = vld [vmem:[%s3056_s30 + $0x10] sm:$0xf] }
 0x4a1   : > { %v1151_v22 = vpop.f32.mrf.mxu3 }
 0x4a2   : > { %v1156_v25 = vpack.c.bf16 %v1151_v22, %v1151_v22  ;;  %v3265_v22 = vld [vmem:[%s3056_s30 + $0x10] sm:$0xf0] }
 0x4a9   : > { %v1270_v51 = vpop.f32.mrf.mxu2  ;;  %v1153_v52 = vpop.f32.mrf.mxu3 }
 0x4aa   : > { %v1295_v53 = vpack.c.bf16 %v1270_v51, %v1270_v51  ;;  %v3268_v51 = vld [vmem:[%s3056_s30 + $0x18] sm:$0xf]  ;;  %v3271_v52 = vld [vmem:[%s3056_s30 + $0x18] sm:$0xf0] }
 0x4ac   : > { %v1579_v54 = vunpack.c.l.b16 %v1295_v53  ;;  %v3274_v53 = vld [vmem:[%s3056_s30 + $0x20] sm:$0xf] }
 0x4ae   : > { %v1581_v55 = vpack.c.b16 %v1579_v54, %v1579_v54  ;;  %v3277_v54 = vld [vmem:[%s3056_s30 + $0x20] sm:$0xf0] }
 0x4b0   : > { %1583 = vrot.lane.b32.xlu1 %v1581_v55, %s2736_s10  ;;  %v3280_v55 = vld [vmem:[%s3056_s30 + $0x28] sm:$0xf] }
 0x4b1   : > { %v1272_v56 = vpop.f32.mrf.mxu2  ;;  %v1291_v57 = vpop.f32.mrf.mxu3 }
 0x4b2   : > { %v1296_v34 = vpack.c.bf16 %v1291_v57, %v1291_v57  ;;  %v3283_v56 = vld [vmem:[%s3056_s30 + $0x28] sm:$0xf0]  ;;  %v3286_v57 = vld [vmem:[%s3056_s30 + $0x30] sm:$0xf] }
 0x4b4   : > { %v1580_v63 = vunpack.c.l.b16 %v1296_v34  ;;  %v2461_v34 = vld [vmem:[%s3543_s28] ss:$0 sm:$0xff] }
 0x4b6   : > { %v1582_v3 = vpack.c.b16 %v1580_v63, %v1580_v63  ;;  %v2500_v63 = vld [vmem:[#allocation2] sm:$0xff] }
 0x4b9   : > { %v1293_v58 = vpop.f32.mrf.mxu3 }
 0x4ba   : > { %v3289_v58 = vld [vmem:[%s3056_s30 + $0x30] sm:$0xf0] }
 0x4e3   : > { %v1410_v28 = vpop.f32.mrf.mxu2 }
 0x4e4   : > { %v1435_v59 = vpack.c.bf16 %v1410_v28, %v1410_v28  ;;  %v3292_v28 = vld [vmem:[%s3056_s30 + $0x38] sm:$0xf] }
 0x4e6   : > { %v1589_v60 = vunpack.c.l.b16 %v1435_v59  ;;  %v3295_v59 = vld [vmem:[%s3056_s30 + $0x38] sm:$0xf0]  ;;  %s3311_s30 = smov 0  }
 0x4e8   : > { %v1591_v61 = vpack.c.b16 %v1589_v60, %v1589_v60  ;;  %v3302_v60 = vld [vmem:[%s874_s13] sm:$0x1] }
 0x4ea   : > { %1593 = vrot.lane.b32.xlu2 %v1591_v61, %s2737_s20 }
 0x4eb   : > { %v1412_v62 = vpop.f32.mrf.mxu2 }
 0x4ec   : > { %v1431_v0 = vpop.f32.mrf.mxu3 }
 0x4ed   : > { %v1436_v1 = vpack.c.bf16 %v1431_v0, %v1431_v0 }
 0x4ef   : > { %v1590_v2 = vunpack.c.l.b16 %v1436_v1 }
 0x4f1   : > { %v1592_v12 = vpack.c.b16 %v1590_v2, %v1590_v2 }
 0x4f2   : > { %1585 = vrot.lane.b32.xlu2 %v1582_v3, %s2736_s10  ;;  %v2501_v3 = vld [vmem:[#allocation2 + $0x8] sm:$0xff] }
 0x4f3   : > { %1595 = vrot.lane.b32.xlu0 %v1592_v12, %s2737_s20  ;;  %v1550_v4 = vpop.f32.mrf.mxu2 }
 0x4f4   : > { %v1433_v5 = vpop.f32.mrf.mxu3  ;;  %v1575_v6 = vpack.c.bf16 %v1550_v4, %v1550_v4 }
 0x4f6   : > { %v1599_v8 = vunpack.c.l.b16 %v1575_v6 }
 0x4f8   : > { %v1601_v10 = vpack.c.b16 %v1599_v8, %v1599_v8 }
 0x4fa   : > { %1603 = vrot.lane.b32.xlu2 %v1601_v10, %s2738_s22 }
 0x4fb   : > { %v1552_v7 = vpop.f32.mrf.mxu2 }
 0x4fc   : > { %v1571_v11 = vpop.f32.mrf.mxu3 }
 0x4fd   : > { %v1576_v13 = vpack.c.bf16 %v1571_v11, %v1571_v11 }
 0x4ff   : > { %v1600_v14 = vunpack.c.l.b16 %v1576_v13 }
 0x501   : > { %v1602_v15 = vpack.c.b16 %v1600_v14, %v1600_v14 }
 0x503   : > { %1605 = vrot.lane.b32.xlu1 %v1602_v15, %s2738_s22 }
 0x504   : > { %v1573_v9 = vpop.f32.mrf.mxu3 }
 0x522   : > { %v1584_v20 = vpop.permute.xlu1 %1583 }
 0x523   : > { %v1609_v26 = vsel %vm1018_vm10, %v1155_v21, %v1584_v20 }
 0x544   : > { %v1594_v19 = vpop.permute.xlu2 %1593 }
 0x545   : > { %v1615_v29 = vsel %vm1613_vm11, %v1609_v26, %v1594_v19 }
 0x54c   : > { %v1586_v45 = vpop.permute.xlu2 %1585 }
 0x54d   : > { %v1612_v30 = vsel %vm1018_vm10, %v1156_v25, %v1586_v45 }
 0x554   : > { %v1604_v23 = vpop.permute.xlu2 %1603 }
 0x555   : > { %v1620_v31 = vsel %vm1618_vm3, %v1615_v29, %v1604_v23 }
 0x556   : > { %v1633_v36 = vunpack.c.l.b16 %v1620_v31 }
 0x565   : > { %v1596_v27 = vpop.permute.xlu0 %1595 }
 0x566   : > { %v1617_v32 = vsel %vm1613_vm11, %v1612_v30, %v1596_v27 }
 0x575   : > { %v1606_v33 = vpop.permute.xlu1 %1605 }
 0x576   : > { %v1622_v35 = vsel %vm1618_vm3, %v1617_v32, %v1606_v33 }
 0x577   : > { %v1634_v37 = vunpack.c.l.b16 %v1622_v35 }
 0x579   : > { %v1635_v38 = vpack.c.b16 %v1634_v37, %v1633_v36 }
 0x57b   : > { %2241 = vmatmul.msk.bf16.vlgmr.msra.gmra.mxu0 %vm910_vm2, %v1635_v38 }
 0x5f8   : > { %v1660_v61 = vpop.f32.mrf.mxu0 }
 0x5f9   : > { %v1661_v62 = vadd.f32 %v2461_v34, %v1660_v61 }
 0x5fb   : > { %v1665_v0 = vadd.f32 %v2500_v63, %v1661_v62 }
 0x5fd   : > { %1667 = vst.msk [vmem:[#allocation2] sm:$0xff] %vm910_vm2, %v1665_v0 }
 0x600   : > { %v1662_v1 = vpop.f32.mrf.mxu0 }
 0x601   : > { %v1663_v2 = vadd.f32 %v2461_v34, %v1662_v1 }
 0x603   : > { %v1666_v12 = vadd.f32 %v2501_v3, %v1663_v2 }
 0x605   : > { %1668 = vst.msk [vmem:[#allocation2 + $0x8] sm:$0xff] %vm910_vm2, %v1666_v12 }
 0x606 LB: >> { %s2242_s19 = sshll.u32 %s2720_s30, 3  ;;  %v2250_v13 = vor.u32 %v3240_v42, %v3237_v41  ;;  %v2246_v14 = vor.u32 %v3234_v40, %v3231_v48  ;;  %v1725_v25 = vperm.slane %v3225_v17, 0  ;;  %v1729_v29 = vperm.slane %v3228_v39, 0  ;;  %s1698_s30 = sadd.s32 1, %s2720_s30   ;;  %s2720_s30 = sphi %s3311_s30, %s1698_s30  }
 0x607   : >> { %s3317_s13 = scalar_lea.vmem [#allocation2], %s2242_s19  ;;  %v2284_v33 = vor.u32 %v3295_v59, %v3292_v28  ;;  %v2280_v35 = vor.u32 %v3289_v58, %v3286_v57  ;;  %v2276_v36 = vor.u32 %v3283_v56, %v3280_v55  ;;  %v2272_v37 = vor.u32 %v3277_v54, %v3274_v53  ;;  %p1695_p2 = scmp.ge.s32.totalorder %s1698_s30, 2  }
 0x608   : >> { %1757 = vmatpush.bf16.msra.mxu0 %v2250_v13  ;;  %v2268_v38 = vor.u32 %v3271_v52, %v3268_v51  ;;  %v2264_v34 = vor.u32 %v3265_v22, %v3262_v50  ;;  %v2260_v61 = vor.u32 %v3259_v47, %v3256_v49  ;;  %v1734_v62 = vperm.slane %v3247_v43, 0 }
 0x609   : >> { %1837 = vmatpush.bf16.msra.mxu1 %v2284_v33  ;;  %v2256_v63 = vor.u32 %v3253_v46, %v3250_v44 }
 0x60c   : >> { %v3320_v4 = vld [vmem:[%s3317_s13] sm:$0xff]  ;;  %1758 = vmatpush.bf16.msra.mxu0 %v2246_v14 }
 0x60d   : >> { %v1702_v5 = vsel %vm910_vm2, %v3320_v4, 0.0  ;;  %1838 = vmatpush.bf16.msra.mxu1 %v2280_v35 }
 0x60e   : >> { %1703 = vadd.xlane.f32.xlu0 %v1702_v5 }
 0x611   : >> { %1839 = vmatpush.bf16.msra.mxu1 %v2276_v36 }
 0x615   : >> { %1840 = vmatpush.bf16.msra.mxu1 %v2272_v37 }
 0x619   : >> { %1841 = vmatpush.bf16.msra.mxu1 %v2268_v38 }
 0x61d   : >> { %1842 = vmatpush.bf16.msra.mxu1 %v2264_v34 }
 0x621   : >> { %1843 = vmatpush.bf16.msra.mxu1 %v2260_v61 }
 0x625   : >> { %1844 = vmatpush.bf16.msra.mxu1 %v2256_v63 }
 0x681   : >> { %v1704_v6 = vpop.xlane.xlu0 %1703 }
 0x682   : >> { %v1705_v8 = vmul.f32 %v1704_v6, %v3065_v24 }
 0x684   : >> { %v1706_v10 = vsub.f32 %v3320_v4, %v1705_v8 }
 0x686   : >> { %v1707_v7 = vmul.f32 %v1706_v10, %v1706_v10 }
 0x688   : >> { %v1708_v11 = vsel %vm910_vm2, %v1707_v7, 0.0 }
 0x689   : >> { %1709 = vadd.xlane.f32.xlu0 %v1708_v11 }
 0x6fc   : >> { %v1710_v15 = vpop.xlane.xlu0 %1709 }
 0x6fd   : >> { %v1711_v9 = vmul.f32 %v1710_v15, %v3065_v24 }
 0x6ff   : >> { %v1712_v16 = vadd.f32 1e-05, %v1711_v9 }
 0x701   : >> { %2502 = vrsqrt.f32 %v1712_v16  ;;  %vm1719_vm4 = vweird.f32 %v1712_v16 }
 0x707   : >> { %v2503_v18 = vpop.eup %2502 }
 0x708   : >> { %v1714_v19 = vmul.f32 %v2503_v18, %v1712_v16  ;;  %vm1720_vm10 = vweird.f32 %v2503_v18 }
 0x709   : >> { %vm1721_vm5 = vmor %vm1719_vm4, %vm1720_vm10 }
 0x70a   : >> { %v1715_v45 = vmul.f32 %v2503_v18, %v1714_v19 }
 0x70c   : >> { %v1716_v20 = vmul.f32 0.5, %v1715_v45 }
 0x70e   : >> { %v1717_v21 = vsub.f32 1.5, %v1716_v20  ;;  %v1787_v20 = vperm.slane %v3302_v60, 0 }
 0x710   : >> { %v1718_v23 = vmul.f32 %v2503_v18, %v1717_v21 }
 0x712   : >> { %v1722_v26 = vsel %vm1721_vm5, %v2503_v18, %v1718_v23 }
 0x713   : >> { %v1723_v27 = vmul.f32 %v1722_v26, %v1706_v10 }
 0x715   : >> { %v1727_v30 = vmul.f32 %v1725_v25, %v1723_v27 }
 0x717   : >> { %v1731_v31 = vadd.f32 %v1729_v29, %v1727_v30 }
 0x719   : >> { %v1732_v32 = vpack.c.bf16 %v1731_v31, %v1731_v31 }
 0x71b   : >> { %2251 = vmatmul.msk.bf16.vlgmr.msra.gmra.mxu0 %vm910_vm2, %v1732_v32 }
 0x798   : >> { %v1760_v0 = vpop.f32.mrf.mxu0 }
 0x799   : >> { %v1761_v1 = vadd.f32 %v1760_v0, %v1734_v62 }
 0x79b   : >> { %v2252_v2 = vmul.f32 -1.702, %v1761_v1 }
 0x79d   : >> { %v1766_v3 = vmul.f32 1.442695, %v2252_v2 }
 0x79f   : >> { %2504 = vpow2.f32 %v1766_v3 }
 0x7a0   : >> { %v1762_v12 = vpop.f32.mrf.mxu0 }
 0x7a5   : >> { %v2505_v5 = vpop.eup %2504 }
 0x7a6   : >> { %v1768_v6 = vadd.f32 1.0, %v2505_v5 }
 0x7a8   : >> { %2506 = vrcp.f32 %v1768_v6  ;;  %v1780_v11 = vand.u32 2147483648, %v1768_v6  ;;  %v1778_v14 = vand.u32 2147483647, %v1768_v6  ;;  %vm1774_vm7 = vweird.f32 %v1768_v6 }
 0x7aa   : >> { %v1781_v9 = vor.u32 1.1754944e-38, %v1780_v11  ;;  %vm1779_vm9 = vcmp.eq.f32.partialorder %v1778_v14, 8.507059e+37 }
 0x7ae   : >> { %v2507_v8 = vpop.eup %2506 }
 0x7af   : >> { %v1770_v10 = vmul.f32 %v2507_v8, %v1768_v6  ;;  %vm1775_vm6 = vweird.f32 %v2507_v8 }
 0x7b0   : >> { %vm1776_vm8 = vmor %vm1774_vm7, %vm1775_vm6 }
 0x7b1   : >> { %v1771_v7 = vsub.f32 1.0, %v1770_v10 }
 0x7b3   : >> { %v1772_v13 = vmul.f32 %v2507_v8, %v1771_v7 }
 0x7b5   : >> { %v1773_v15 = vadd.f32 %v2507_v8, %v1772_v13 }
 0x7b7   : >> { %v1777_v16 = vsel %vm1776_vm8, %v2507_v8, %v1773_v15 }
 0x7b8   : >> { %v1782_v18 = vsel %vm1779_vm9, %v1781_v9, %v1777_v16 }
 0x7b9   : >> { %v1784_v19 = vmul.f32 %v1782_v18, %v1761_v1 }
 0x7bb   : >> { %v1785_v45 = vpack.c.bf16 %v1784_v19, %v1784_v19 }
 0x7bd   : >> { %1845 = vmatmul.bf16.vlgmr.msra.gmra.mxu1 %v1785_v45 }
 0x83a   : >> { %v1846_v21 = vpop.f32.mrf.mxu1 }
 0x83b   : >> { %v1847_v23 = vadd.f32 %v1846_v21, %v1787_v20 }
 0x83d   : >> { %v1850_v25 = vadd.f32 %v1847_v23, %v3320_v4 }
 0x83e   : > { %1697 = sbr.rel (!%p1695_p2) target bundleno = 1542 (0x606), region = 207 }
 0x83f   : >> { %1851 = vst.msk [vmem:[%s3317_s13] sm:$0xff] %vm910_vm2, %v1850_v25 }
 0x842   : >> { %v1848_v26 = vpop.f32.mrf.mxu1 }
 0x843   : > { %1854 = sbr.rel (%p2207_p0) target bundleno = 2537 (0x9e9), region = 123  ;;  %s3544_s7 = sld [smem:[#allocation31_spill]] (!%p2207_p0) }
 0x844   : > { %s3545_s22 = sld [smem:[#allocation49_spill]] (!%p2207_p0) }
 0x845   : > { %s3546_s25 = sld [smem:[#allocation47_spill]] (!%p2207_p0) }
 0x846   : > { %s3547_s26 = sld [smem:[#allocation48_spill]] (!%p2207_p0) }
 0x848   : > { %vm1867_vm12 = vcmask 1040384   ;;  %vm1871_vm13 = vcmask 254976  }
 0x849   : > { %s1856_s4 = sld [smem:[#allocation4 + %s3544_s7]]  ;;  %s1859_s3 = sadd.s32 1, %s3544_s7 }
 0x84a   : > { %s1860_s2 = sld [smem:[#allocation4 + %s1859_s3]]  ;;  %v2320_v41 = vld [vmem:[%s3545_s22 + $0x8] sm:$0xff]  ;;  %v2319_v42 = vld [vmem:[%s3545_s22] sm:$0xff] }
 0x84b   : > { %1928 = vmatpush.bf16.msra.mxu0 %v2320_v41  ;;  %v2508_v53 = vld [vmem:[%s3546_s25] ss:$0 sm:$0xff] }
 0x84f   : > { %s1857_s10 = scalar_lea.vmem [#allocation2], %s1856_s4  ;;  %1929 = vmatpush.bf16.msra.mxu0 %v2319_v42 }
 0x850   : > { %v1858_v27 = vld [vmem:[%s1857_s10] sm:$0x1]  ;;  %s2049_s20 = scalar_lea.vmem [#allocation2], %s1860_s2 }
 0x851   : > { %v2287_v4 = vld [vmem:[%s2049_s20 + $0x8] sm:$0x1] }
 0x852   : > { %v1865_v29 = vrot.slane %v2287_v4, 7 }
 0x854   : > { %v1868_v30 = vsel %vm1867_vm12, %v1858_v27, %v1865_v29 }
 0x855   : > { %v1872_v31 = vsel %vm1871_vm13, %v1868_v30, 0.0 }
 0x856   : > { %1873 = vadd.xlane.f32.xlu0 %v1872_v31 }
 0x8c9   : > { %v1874_v32 = vpop.xlane.xlu0 %1873 }
 0x8ca   : > { %v1875_v17 = vmul.f32 %v1874_v32, %v3065_v24 }
 0x8cc   : > { %v1876_v39 = vsub.f32 %v1868_v30, %v1875_v17 }
 0x8ce   : > { %v1877_v48 = vmul.f32 %v1876_v39, %v1876_v39 }
 0x8d0   : > { %v1878_v40 = vsel %vm1871_vm13, %v1877_v48, 0.0 }
 0x8d1   : > { %1879 = vadd.xlane.f32.xlu0 %v1878_v40 }
 0x944   : > { %v1880_v43 = vpop.xlane.xlu0 %1879 }
 0x945   : > { %v1881_v44 = vmul.f32 %v1880_v43, %v3065_v24  ;;  %v2509_v24 = vld [vmem:[%s3547_s26] ss:$0 sm:$0xff] }
 0x947   : > { %v1882_v46 = vadd.f32 1e-05, %v1881_v44 }
 0x949   : > { %2510 = vrsqrt.f32 %v1882_v46  ;;  %vm1889_vm15 = vweird.f32 %v1882_v46 }
 0x94f   : > { %v2511_v49 = vpop.eup %2510 }
 0x950   : > { %v1884_v47 = vmul.f32 %v2511_v49, %v1882_v46  ;;  %vm1890_vm14 = vweird.f32 %v2511_v49 }
 0x951   : > { %vm1891_vm0 = vmor %vm1889_vm15, %vm1890_vm14 }
 0x952   : > { %v1885_v50 = vmul.f32 %v2511_v49, %v1884_v47 }
 0x954   : > { %v1886_v22 = vmul.f32 0.5, %v1885_v50 }
 0x956   : > { %v1887_v51 = vsub.f32 1.5, %v1886_v22 }
 0x958   : > { %v1888_v52 = vmul.f32 %v2511_v49, %v1887_v51 }
 0x95a   : > { %v1892_v54 = vsel %vm1891_vm0, %v2511_v49, %v1888_v52 }
 0x95b   : > { %v1893_v55 = vmul.f32 %v1892_v54, %v1876_v39 }
 0x95d   : > { %v1897_v56 = vmul.f32 %v2508_v53, %v1893_v55 }
 0x95f   : > { %v1901_v57 = vadd.f32 %v2509_v24, %v1897_v56 }
 0x961   : > { %v1902_v58 = vpack.c.bf16 %v1901_v57, %v1901_v57 }
 0x963   : > { %2296 = vmatmul.msk.bf16.vlgmr.msra.gmra.mxu0 %vm910_vm2, %v1902_v58 }
 0x9e0   : > { %v1931_v28 = vpop.f32.mrf.mxu0 }
 0x9e1   : > { %1935 = vst.msk [vmem:[%s821_s27] sm:$0x3] %vm1871_vm13, %v1931_v28 }
 0x9e8   : > { %v1933_v59 = vpop.f32.mrf.mxu0 }
 0x9e9 PF: > { %s3548_s21 = sld [smem:[#allocation31_spill]]  ;;  %s1949_s19 = sshll.u32 %s821_s27, 4  ;;  %s1950_s19 = int_to_ptr.vmem [resolvable:$true] %s1949_s19 }
 0x9ea   : > { %s3549_s18 = sld [smem:[#allocation50_spill]] }
 0x9eb   : > { %s3550_s12 = sld [smem:[#allocation17_spill]] }
 0x9f0   : > { %s1947_s30 = scalar_lea.hbm %s3549_s18, %s3548_s21  ;;  %s2604_s14 = scalar_lea.hbm %s3549_s18, 4 }
 0x9f1   : > { %s1951_s13 = sshll.u32 %s1947_s30, 4  ;;  %s3552_s7 = sand.u32 1, %s3550_s12   ;;  %s1952_s13 = int_to_ptr.hbm [resolvable:$true] %s1951_s13 }
 0x9f2   : > { %s1937_s4 = scalar_lea.sflag [#allocation8], %s3552_s7  ;;  %s2598_s3 = sshra.s32 %s1952_s13, 4  ;;  %s2599_s3 = int_to_ptr.hbm [resolvable:$true] %s2598_s3 }
 0x9f3   : > { %s2600_s2 = scalar_lea.hbm %s2599_s3, 2  ;;  %p2605_p8 = scmp.lt.s32.totalorder %s2599_s3, %s3549_s18 }
 0x9f4   : > { %p2601_p4 = scmp.ne.s32.totalorder %s2599_s3, %s2600_s2  ;;  %p2606_p10 = scmp.lt.s32.totalorder %s2604_s14, %s2600_s2 }
 0x9f6   : > { %p2602_p5 = pnand %p2601_p4, %p2920_p7  ;;  %p2607_p12 = por %p2606_p10, %p2605_p8 }
 0x9f8   : > { %p2603_p6 = pneg %p2602_p5 }
 0x9fa   : > { %p2608_p13 = pnand %p2607_p12, %p2603_p6 }
 0x9fc   : > { %2611 = shalt.err (!%p2608_p13)
}
 0x9fd   : > { %2327 = dma.vmem_to_hbm [thread:$0]  (%p2920_p7), %s1950_s19, 32, %s1952_s13, %s1937_s4  }
 0x9fe PF: > { %s3553_s11 = sld [smem:[#allocation23_spill]] }
 0x9ff   : > { %s3554_s27 = sld [smem:[#allocation16_spill]] }
 0xa04   : > { %p2344_p1 = scmp.ge.s32.totalorder %s3553_s11, 2 }
 0xa05   : > { %s1963_s17 = sand.u32 1, %s3554_s27  }
 0xa06   : > { %p2338_p11 = pnand %p2344_p1, %p2925_p9  ;;  %s1964_s24 = scalar_lea.sflag [#allocation8], %s1963_s17 }
 0xa08   : > { %p2339_p3 = pneg %p2338_p11 }
 0xa0a   : > { %2671 = dma.done.wait (%p2339_p3), %s1964_s24, 32  }
 0xa0b   : > { %2673 = vsyncadd (%p2339_p3), %s1964_s24, 4294967264  ;;  %s46_s21 = sadd.s32 1, %s3553_s11   ;;  %s3556_s3 = sld [smem:[#allocation17_spill]] }
 0xa0c   : > { %p43_p0 = scmp.ge.s32.totalorder %s46_s21, 6   ;;  %s3557_s26 = sld [smem:[#allocation18_spill]] }
 0xa0d   : > { %s3558_s27 = sld [smem:[#allocation29_spill]] }
 0xa0e   : > { %s3559_s28 = sld [smem:[#allocation19_spill]] }
 0xa0f   : > { %s3560_s15 = sld [smem:[#allocation20_spill]] }
 0xa10   : > { %s3561_s4 = sld [smem:[#allocation28_spill]]  ;;  %45 = sbr.rel (!%p43_p0) target bundleno = 41 (0x29), region = 218 }
 0xa11   : > { %s3562_s14 = sld [smem:[#allocation21_spill]] }
 0xa12   : > { %s3563_s29 = sld [smem:[#allocation22_spill]] }
 0xa13   : > { %s3564_s30 = sld [smem:[#allocation26_spill]] }
 0xa14   : > { %s3565_s0 = sld [smem:[#allocation27_spill]] }
 0xa15   :  { %1970 = vsyncpa [#allocation7], 1 }
 0xa16   :  { %1972 = vsyncpa [#allocation7 + $0x1], 1 }
 0xa17   :  { %1973 = vsyncpa [#allocation10], 1 }
 0xa18   :  { %1975 = vsyncpa [#allocation10 + $0x1], 1 }
 0xa19   :  { %1976 = vsyncpa [#allocation8], 1 }
 0xa1a   :  { %1978 = vsyncpa [#allocation8 + $0x1], 1 }

</bundles_post_ra>
